<compile_context>
chip_gen: v6e
topology: v6e:2x2x1
jax: 0.10.0
libtpu: 0.0.40
codegen_flags: <defaults>
</compile_context>

<pallas_src>
import functools

import numpy as np
import jax
import jax.numpy as jnp
from jax import lax
from jax.experimental import pallas as pl
from jax.experimental.pallas import tpu as pltpu

EPS = 1e-7
# Vectorize the path gather when the (2N, V, T) f32 broadcast stays small.
_VEC_GATHER_BYTES = 8 * 1024 * 1024


# ----------------------------------------------------------------------------
# Pallas kernel: log-softmax gather + path-mass + hinge, per-batch outputs
# ----------------------------------------------------------------------------
def _awp_kernel(len_ref, logits_ref, paths_ref, loss_ref, *,
                n_paths, margin, bb, vectorize_paths):
    blk = pl.program_id(0)
    v_dim = logits_ref.shape[1]
    t_dim = logits_ref.shape[2]

    # sublane (vocab) and lane (time) index grids, shared by all batch elements
    v_iota = lax.broadcasted_iota(jnp.int32, (v_dim, t_dim), 0)   # (V, T)
    t_iota = lax.broadcasted_iota(jnp.int32, (1, t_dim), 1)       # (1, T)

    for i in range(bb):                                            # static, BB <= 8
        x = logits_ref[i]                                          # (V, T) f32

        # log-sum-exp over the vocab (sublane) axis, once per batch element
        m = jnp.max(x, axis=0, keepdims=True)                      # (1, T)
        lse = m + jnp.log(jnp.sum(jnp.exp(x - m), axis=0, keepdims=True))

        length = jnp.maximum(len_ref[blk * bb + i], 1)             # clamp: no div-by-0
        inv_len = 1.0 / length.astype(jnp.float32)                 # once per element
        t_mask = t_iota < length                                   # (1, T)

        if vectorize_paths:
            # one-hot gather for all 2N paths at once:
            #   g[n, t] = x[path[n, t], t]   (no TPU dynamic gather needed)
            cols = paths_ref[i]                                    # (2N, T) int32
            g = jnp.sum(jnp.where(v_iota[None] == cols[:, None, :],
                                  x[None], 0.0), axis=1)           # (2N, T)
            # log(softmax + eps) == log(exp(logit - lse) + eps)
            lp = jnp.log(jnp.exp(g - lse) + EPS)                   # (2N, T)
            lp = jnp.where(t_mask, lp, 0.0)                        # zero past pred_len
            mass = jnp.sum(lp, axis=1, keepdims=True) * inv_len    # (2N, 1)
            diff = mass[:n_paths] - mass[n_paths:]                 # sampled - shifted
            h = jnp.maximum(diff + margin, 0.0)                    # (N, 1)
            if margin > 0:
                h = h * jnp.where(jnp.abs(diff) > 0.0, 1.0, 0.0)
            acc = jnp.sum(h, axis=0, keepdims=True)                # (1, 1)
        else:
            # fallback: per-path masked sublane reduction (bounded VMEM footprint)
            def path_mass(n):
                col = paths_ref[i, n:n + 1, :]                     # (1, T) int32
                g = jnp.sum(jnp.where(v_iota == col, x, 0.0),
                            axis=0, keepdims=True)                 # (1, T)
                lp = jnp.log(jnp.exp(g - lse) + EPS)
                lp = jnp.where(t_mask, lp, 0.0)
                return jnp.sum(lp, axis=1, keepdims=True) * inv_len  # (1, 1)

            acc = jnp.zeros((1, 1), dtype=jnp.float32)
            for n in range(n_paths):                               # static, N = 5
                diff = path_mass(n) - path_mass(n + n_paths)
                hn = jnp.maximum(diff + margin, 0.0)
                if margin > 0:
                    hn = hn * jnp.where(jnp.abs(diff) > 0.0, 1.0, 0.0)
                acc = acc + hn

        loss_ref[0, i:i + 1, :] = acc                              # per-batch partial


def awp_loss(logits_bvt, sampled_btn, shifted_btn, pred_length, *, margin=0.0):
    """logits_bvt: (B, V, T) f32; paths: (B, T, N) int32; pred_length: (B,) int32."""
    B, V, T = logits_bvt.shape
    N = sampled_btn.shape[-1]

    # pack both path sets as (B, 2N, T): time on lanes, sampled first then shifted
    paths = jnp.concatenate(
        [jnp.transpose(sampled_btn, (0, 2, 1)),
         jnp.transpose(shifted_btn, (0, 2, 1))], axis=1).astype(jnp.int32)

    logits_bvt = logits_bvt.astype(jnp.float32)
    pred_length = pred_length.astype(jnp.int32)

    # Batch blocking: prefer a divisor of B (no HBM padding copy of the logits);
    # pad to a multiple of 8 only for pathological batch sizes (prime B > 8).
    BB = next(bb for bb in range(min(B, 8), 0, -1) if B % bb == 0)
    B_pad = B
    if BB < 4 and B > 8:
        BB = 8
        B_pad = ((B + BB - 1) // BB) * BB
        pad = B_pad - B
        logits_bvt = jnp.pad(logits_bvt, ((0, pad), (0, 0), (0, 0)))
        paths = jnp.pad(paths, ((0, pad), (0, 0), (0, 0)))
        pred_length = jnp.pad(pred_length, (0, pad), constant_values=1)

    G = B_pad // BB
    vectorize_paths = (2 * N * V * T * 4) <= _VEC_GATHER_BYTES

    kernel = functools.partial(_awp_kernel, n_paths=N, margin=float(margin),
                               bb=BB, vectorize_paths=vectorize_paths)
    per_batch = pl.pallas_call(
        kernel,
        out_shape=jax.ShapeDtypeStruct((G, BB, 1), jnp.float32),
        grid_spec=pltpu.PrefetchScalarGridSpec(
            num_scalar_prefetch=1,
            grid=(G,),
            in_specs=[
                pl.BlockSpec((BB, V, T), lambda b, L: (b, 0, 0)),
                pl.BlockSpec((BB, 2 * N, T), lambda b, L: (b, 0, 0)),
            ],
            out_specs=pl.BlockSpec((1, BB, 1), lambda b, L: (b, 0, 0)),
        ),
        compiler_params=pltpu.CompilerParams(dimension_semantics=("parallel",)),
    )(pred_length, logits_bvt, paths)

    return jnp.sum(per_batch.reshape(B_pad)[:B]) / B


# ----------------------------------------------------------------------------
# Host-side glue (stochastic path sampling / shifting — no Pallas equivalent)
# ----------------------------------------------------------------------------
def shift_f_low_latency_np(sampled_np, blank_index, k=1, seed=0):
    """Mirror of AlignWithPurpose.shift_f_low_latency / _shift_k on (B, T, N) paths."""
    rng = np.random.default_rng(seed)
    B, T, N = sampled_np.shape
    out = np.array(sampled_np, copy=True)
    for b in range(B):
        for n in range(N):
            path = list(int(v) for v in sampled_np[b, :, n])
            idxs = [i for i in range(T)
                    if (path[i] == blank_index and i == 0)
                    or (i > 0 and path[i] == path[i - 1])]
            if len(idxs) == 0:
                continue
            shift_items = []
            for _ in range(k):
                if len(idxs) == 0:
                    break
                ri = int(rng.integers(0, max(len(idxs) - 1, 1)))
                shift_items.append(idxs.pop(ri))
            new_path = [p for i, p in enumerate(path) if i not in shift_items]
            new_path += [blank_index] * len(shift_items)
            out[b, :, n] = np.asarray(new_path, dtype=out.dtype)
    return out

# TODO(synk): shift_f_minimum_wer (Levenshtein alignment over text) is host-side
# string processing with no Pallas equivalent; only f_low_latency is implemented.


def ref_loss(logits_btv, sampled, shifted, lengths, margin):
    """Pure-JAX reference of the numeric part (matches _paths_mass_prob + hinge)."""
    B, T, V = logits_btv.shape
    probs = jax.nn.softmax(logits_btv, axis=-1)

    def mass(paths):
        g = jnp.take_along_axis(probs, paths, axis=-1)           # (B, T, N)
        lp = jnp.log(g + EPS)
        tmask = jnp.arange(T)[None, :, None] < lengths[:, None, None]
        lp = jnp.where(tmask, lp, 0.0)
        return jnp.sum(lp, axis=1) / lengths[:, None].astype(jnp.float32)  # (B, N)

    diff = mass(sampled) - mass(shifted)
    loss = jnp.maximum(diff + margin, 0.0)
    if margin > 0:
        loss = loss * (jnp.abs(diff) > 0).astype(loss.dtype)
    return jnp.sum(loss) / B


# ----------------------------------------------------------------------------
if __name__ == "__main__":
    B, V, T, N = 2, 32, 16, 5          # small shapes consistent with B x V x 1 x T
    blank_index = 28
    margin = 0.0

    key = jax.random.PRNGKey(0)
    k_logits, k_sample = jax.random.split(key)

    # PyTorch-layout input: B x V x 1 x T
    logits_nchw = jax.random.normal(k_logits, (B, V, 1, T), dtype=jnp.float32)
    model_pred_length = jnp.array([T, T - 4], dtype=jnp.int32)

    # kernel layout: only a squeeze, no transpose of the logits tensor
    logits_bvt = logits_nchw[:, :, 0, :]                            # (B, V, T)

    # path sampling (equivalent to WeightedRandomSampler over softmax probs)
    sampled = jax.random.categorical(k_sample, logits_bvt, axis=1, shape=(N, B, T))
    sampled = jnp.transpose(sampled, (1, 2, 0)).astype(jnp.int32)   # (B, T, N)

    shifted = jnp.asarray(
        shift_f_low_latency_np(np.asarray(sampled), blank_index, k=1, seed=0),
        dtype=jnp.int32)

    loss = awp_loss(logits_bvt, sampled, shifted, model_pred_length, margin=margin)
    loss = jax.block_until_ready(loss)

    # reference uses the (B, T, V) layout to mirror the PyTorch gather(dim=2)
    logits_btv = jnp.transpose(logits_bvt, (0, 2, 1))
    ref = jax.block_until_ready(
        ref_loss(logits_btv, sampled, shifted, model_pred_length, margin))

    assert np.isclose(float(loss), float(ref), rtol=1e-4, atol=1e-5), (
        f"kernel={float(loss)} ref={float(ref)}")
    print("KERNEL_OK")
</pallas_src>

<mosaic_0001>
module attributes {stable_mosaic.version = 11 : i64} {
  func.func @_awp_kernel(%arg0: i32, %arg1: memref<2xi32, #tpu.memory_space<smem>>, %arg2: memref<2x32x16xf32, #tpu.memory_space<vmem>>, %arg3: memref<2x10x16xi32, #tpu.memory_space<vmem>>, %arg4: memref<1x2x1xf32, #tpu.memory_space<vmem>>) attributes {dimension_semantics = [#tpu.dimension_semantics<parallel>], iteration_bounds = array<i64: 1>, scalar_prefetch = 1 : i64, scratch_operands = 0 : i64, tpu.core_type = #tpu.core_type<tc>, window_params = [{transform_indices = @transform_0, window_bounds = array<i64: 2, 32, 16>}, {transform_indices = @transform_1, window_bounds = array<i64: 2, 10, 16>}, {transform_indices = @transform_2, window_bounds = array<i64: 1, 2, 1>}]} {
    %0 = tpu.iota {dimensions = array<i32: 0>} : vector<32x16xi32>
    %1 = tpu.iota {dimensions = array<i32: 1>} : vector<1x16xi32>
    %c0 = arith.constant 0 : index
    %c0_0 = arith.constant 0 : index
    %c0_1 = arith.constant 0 : index
    %2 = vector.load %arg2[%c0, %c0_0, %c0_1] : memref<2x32x16xf32, #tpu.memory_space<vmem>>, vector<1x32x16xf32>
    %3 = vector.shape_cast %2 : vector<1x32x16xf32> to vector<32x16xf32>
    %cst = arith.constant dense<0xFF800000> : vector<16xf32>
    %4 = vector.multi_reduction <maximumf>, %3, %cst [0] : vector<32x16xf32> to vector<16xf32>
    %5 = vector.shape_cast %4 : vector<16xf32> to vector<1x16xf32>
    %6 = vector.broadcast %5 : vector<1x16xf32> to vector<32x16xf32>
    %7 = arith.subf %3, %6 : vector<32x16xf32>
    %8 = math.exp %7 : vector<32x16xf32>
    %cst_2 = arith.constant dense<0.000000e+00> : vector<16xf32>
    %9 = vector.multi_reduction <add>, %8, %cst_2 [0] : vector<32x16xf32> to vector<16xf32>
    %10 = vector.shape_cast %9 : vector<16xf32> to vector<1x16xf32>
    %11 = math.log %10 : vector<1x16xf32>
    %12 = arith.addf %5, %11 : vector<1x16xf32>
    %c2_i32 = arith.constant 2 : i32
    %13 = arith.muli %arg0, %c2_i32 : i32
    %c0_i32 = arith.constant 0 : i32
    %14 = arith.addi %13, %c0_i32 : i32
    %15 = arith.index_cast %14 : i32 to index
    %16 = memref.load %arg1[%15] : memref<2xi32, #tpu.memory_space<smem>>
    %c1_i32 = arith.constant 1 : i32
    %17 = arith.maxsi %16, %c1_i32 : i32
    %18 = arith.sitofp %17 : i32 to f32
    %cst_3 = arith.constant 1.000000e+00 : f32
    %19 = arith.divf %cst_3, %18 : f32
    %20 = vector.broadcast %17 : i32 to vector<1x16xi32>
    %21 = arith.cmpi slt, %1, %20 : vector<1x16xi32>
    %c0_4 = arith.constant 0 : index
    %c0_5 = arith.constant 0 : index
    %c0_6 = arith.constant 0 : index
    %22 = vector.load %arg3[%c0_4, %c0_5, %c0_6] : memref<2x10x16xi32, #tpu.memory_space<vmem>>, vector<1x10x16xi32>
    %23 = vector.shape_cast %22 : vector<1x10x16xi32> to vector<10x16xi32>
    %24 = vector.shape_cast %0 : vector<32x16xi32> to vector<1x32x16xi32>
    %25 = vector.shape_cast %23 : vector<10x16xi32> to vector<10x1x16xi32>
    %26 = vector.broadcast %24 : vector<1x32x16xi32> to vector<10x32x16xi32>
    %27 = vector.broadcast %25 : vector<10x1x16xi32> to vector<10x32x16xi32>
    %28 = arith.cmpi eq, %26, %27 : vector<10x32x16xi32>
    %29 = vector.shape_cast %3 : vector<32x16xf32> to vector<1x32x16xf32>
    %cst_7 = arith.constant 0.000000e+00 : f32
    %30 = vector.shape_cast %29 : vector<1x32x16xf32> to vector<1x32x16xf32>
    %31 = vector.broadcast %30 : vector<1x32x16xf32> to vector<10x32x16xf32>
    %32 = vector.broadcast %cst_7 : f32 to vector<10x32x16xf32>
    %33 = arith.select %28, %31, %32 : vector<10x32x16xi1>, vector<10x32x16xf32>
    %cst_8 = arith.constant dense<0.000000e+00> : vector<10x16xf32>
    %34 = vector.multi_reduction <add>, %33, %cst_8 [1] : vector<10x32x16xf32> to vector<10x16xf32>
    %35 = vector.broadcast %12 : vector<1x16xf32> to vector<10x16xf32>
    %36 = arith.subf %34, %35 : vector<10x16xf32>
    %37 = math.exp %36 : vector<10x16xf32>
    %cst_9 = arith.constant 1.000000e-07 : f32
    %38 = vector.broadcast %cst_9 : f32 to vector<10x16xf32>
    %39 = arith.addf %37, %38 : vector<10x16xf32>
    %40 = math.log %39 : vector<10x16xf32>
    %cst_10 = arith.constant 0.000000e+00 : f32
    %41 = vector.shape_cast %21 : vector<1x16xi1> to vector<1x16xi1>
    %42 = vector.broadcast %41 : vector<1x16xi1> to vector<10x16xi1>
    %43 = vector.broadcast %cst_10 : f32 to vector<10x16xf32>
    %44 = arith.select %42, %40, %43 : vector<10x16xi1>, vector<10x16xf32>
    %cst_11 = arith.constant dense<0.000000e+00> : vector<10xf32>
    %45 = vector.multi_reduction <add>, %44, %cst_11 [1] : vector<10x16xf32> to vector<10xf32>
    %46 = vector.shape_cast %45 : vector<10xf32> to vector<10x1xf32>
    %47 = vector.broadcast %19 : f32 to vector<10x1xf32>
    %48 = arith.mulf %46, %47 : vector<10x1xf32>
    %49 = vector.extract_strided_slice %48 {offsets = [0, 0], sizes = [5, 1], strides = [1, 1]} : vector<10x1xf32> to vector<5x1xf32>
    %50 = vector.extract_strided_slice %48 {offsets = [5, 0], sizes = [5, 1], strides = [1, 1]} : vector<10x1xf32> to vector<5x1xf32>
    %51 = arith.subf %49, %50 : vector<5x1xf32>
    %cst_12 = arith.constant 0.000000e+00 : f32
    %52 = vector.broadcast %cst_12 : f32 to vector<5x1xf32>
    %53 = arith.addf %51, %52 : vector<5x1xf32>
    %cst_13 = arith.constant 0.000000e+00 : f32
    %54 = vector.broadcast %cst_13 : f32 to vector<5x1xf32>
    %55 = arith.maximumf %53, %54 : vector<5x1xf32>
    %cst_14 = arith.constant dense<0.000000e+00> : vector<1xf32>
    %56 = vector.multi_reduction <add>, %55, %cst_14 [0] : vector<5x1xf32> to vector<1xf32>
    %57 = vector.shape_cast %56 : vector<1xf32> to vector<1x1xf32>
    %c0_15 = arith.constant 0 : index
    %c0_16 = arith.constant 0 : index
    %c0_17 = arith.constant 0 : index
    %58 = vector.load %arg4[%c0_15, %c0_16, %c0_17] : memref<1x2x1xf32, #tpu.memory_space<vmem>>, vector<1x1x1xf32>
    %59 = vector.shape_cast %58 : vector<1x1x1xf32> to vector<1x1xf32>
    %60 = vector.shape_cast %57 : vector<1x1xf32> to vector<1x1x1xf32>
    tpu.vector_store %arg4[%c0_15, %c0_16, %c0_17], %60 {strides = array<i32>} : memref<1x2x1xf32, #tpu.memory_space<vmem>>, vector<1x1x1xf32>,
    %c1 = arith.constant 1 : index
    %c0_18 = arith.constant 0 : index
    %c0_19 = arith.constant 0 : index
    %61 = vector.load %arg2[%c1, %c0_18, %c0_19] : memref<2x32x16xf32, #tpu.memory_space<vmem>>, vector<1x32x16xf32>
    %62 = vector.shape_cast %61 : vector<1x32x16xf32> to vector<32x16xf32>
    %cst_20 = arith.constant dense<0xFF800000> : vector<16xf32>
    %63 = vector.multi_reduction <maximumf>, %62, %cst_20 [0] : vector<32x16xf32> to vector<16xf32>
    %64 = vector.shape_cast %63 : vector<16xf32> to vector<1x16xf32>
    %65 = vector.broadcast %64 : vector<1x16xf32> to vector<32x16xf32>
    %66 = arith.subf %62, %65 : vector<32x16xf32>
    %67 = math.exp %66 : vector<32x16xf32>
    %cst_21 = arith.constant dense<0.000000e+00> : vector<16xf32>
    %68 = vector.multi_reduction <add>, %67, %cst_21 [0] : vector<32x16xf32> to vector<16xf32>
    %69 = vector.shape_cast %68 : vector<16xf32> to vector<1x16xf32>
    %70 = math.log %69 : vector<1x16xf32>
    %71 = arith.addf %64, %70 : vector<1x16xf32>
    %c2_i32_22 = arith.constant 2 : i32
    %72 = arith.muli %arg0, %c2_i32_22 : i32
    %c1_i32_23 = arith.constant 1 : i32
    %73 = arith.addi %72, %c1_i32_23 : i32
    %74 = arith.index_cast %73 : i32 to index
    %75 = memref.load %arg1[%74] : memref<2xi32, #tpu.memory_space<smem>>
    %c1_i32_24 = arith.constant 1 : i32
    %76 = arith.maxsi %75, %c1_i32_24 : i32
    %77 = arith.sitofp %76 : i32 to f32
    %cst_25 = arith.constant 1.000000e+00 : f32
    %78 = arith.divf %cst_25, %77 : f32
    %79 = vector.broadcast %76 : i32 to vector<1x16xi32>
    %80 = arith.cmpi slt, %1, %79 : vector<1x16xi32>
    %c1_26 = arith.constant 1 : index
    %c0_27 = arith.constant 0 : index
    %c0_28 = arith.constant 0 : index
    %81 = vector.load %arg3[%c1_26, %c0_27, %c0_28] : memref<2x10x16xi32, #tpu.memory_space<vmem>>, vector<1x10x16xi32>
    %82 = vector.shape_cast %81 : vector<1x10x16xi32> to vector<10x16xi32>
    %83 = vector.shape_cast %0 : vector<32x16xi32> to vector<1x32x16xi32>
    %84 = vector.shape_cast %82 : vector<10x16xi32> to vector<10x1x16xi32>
    %85 = vector.broadcast %83 : vector<1x32x16xi32> to vector<10x32x16xi32>
    %86 = vector.broadcast %84 : vector<10x1x16xi32> to vector<10x32x16xi32>
    %87 = arith.cmpi eq, %85, %86 : vector<10x32x16xi32>
    %88 = vector.shape_cast %62 : vector<32x16xf32> to vector<1x32x16xf32>
    %cst_29 = arith.constant 0.000000e+00 : f32
    %89 = vector.shape_cast %88 : vector<1x32x16xf32> to vector<1x32x16xf32>
    %90 = vector.broadcast %89 : vector<1x32x16xf32> to vector<10x32x16xf32>
    %91 = vector.broadcast %cst_29 : f32 to vector<10x32x16xf32>
    %92 = arith.select %87, %90, %91 : vector<10x32x16xi1>, vector<10x32x16xf32>
    %cst_30 = arith.constant dense<0.000000e+00> : vector<10x16xf32>
    %93 = vector.multi_reduction <add>, %92, %cst_30 [1] : vector<10x32x16xf32> to vector<10x16xf32>
    %94 = vector.broadcast %71 : vector<1x16xf32> to vector<10x16xf32>
    %95 = arith.subf %93, %94 : vector<10x16xf32>
    %96 = math.exp %95 : vector<10x16xf32>
    %cst_31 = arith.constant 1.000000e-07 : f32
    %97 = vector.broadcast %cst_31 : f32 to vector<10x16xf32>
    %98 = arith.addf %96, %97 : vector<10x16xf32>
    %99 = math.log %98 : vector<10x16xf32>
    %cst_32 = arith.constant 0.000000e+00 : f32
    %100 = vector.shape_cast %80 : vector<1x16xi1> to vector<1x16xi1>
    %101 = vector.broadcast %100 : vector<1x16xi1> to vector<10x16xi1>
    %102 = vector.broadcast %cst_32 : f32 to vector<10x16xf32>
    %103 = arith.select %101, %99, %102 : vector<10x16xi1>, vector<10x16xf32>
    %cst_33 = arith.constant dense<0.000000e+00> : vector<10xf32>
    %104 = vector.multi_reduction <add>, %103, %cst_33 [1] : vector<10x16xf32> to vector<10xf32>
    %105 = vector.shape_cast %104 : vector<10xf32> to vector<10x1xf32>
    %106 = vector.broadcast %78 : f32 to vector<10x1xf32>
    %107 = arith.mulf %105, %106 : vector<10x1xf32>
    %108 = vector.extract_strided_slice %107 {offsets = [0, 0], sizes = [5, 1], strides = [1, 1]} : vector<10x1xf32> to vector<5x1xf32>
    %109 = vector.extract_strided_slice %107 {offsets = [5, 0], sizes = [5, 1], strides = [1, 1]} : vector<10x1xf32> to vector<5x1xf32>
    %110 = arith.subf %108, %109 : vector<5x1xf32>
    %cst_34 = arith.constant 0.000000e+00 : f32
    %111 = vector.broadcast %cst_34 : f32 to vector<5x1xf32>
    %112 = arith.addf %110, %111 : vector<5x1xf32>
    %cst_35 = arith.constant 0.000000e+00 : f32
    %113 = vector.broadcast %cst_35 : f32 to vector<5x1xf32>
    %114 = arith.maximumf %112, %113 : vector<5x1xf32>
    %cst_36 = arith.constant dense<0.000000e+00> : vector<1xf32>
    %115 = vector.multi_reduction <add>, %114, %cst_36 [0] : vector<5x1xf32> to vector<1xf32>
    %116 = vector.shape_cast %115 : vector<1xf32> to vector<1x1xf32>
    %c0_37 = arith.constant 0 : index
    %c1_38 = arith.constant 1 : index
    %c0_39 = arith.constant 0 : index
    %117 = vector.load %arg4[%c0_37, %c1_38, %c0_39] : memref<1x2x1xf32, #tpu.memory_space<vmem>>, vector<1x1x1xf32>
    %118 = vector.shape_cast %117 : vector<1x1x1xf32> to vector<1x1xf32>
    %119 = vector.shape_cast %116 : vector<1x1xf32> to vector<1x1x1xf32>
    tpu.vector_store %arg4[%c0_37, %c1_38, %c0_39], %119 {strides = array<i32>} : memref<1x2x1xf32, #tpu.memory_space<vmem>>, vector<1x1x1xf32>,
    return
  }
  func.func @transform_0(%arg0: i32, %arg1: memref<2xi32, #tpu.memory_space<smem>>) -> (i32, i32, i32) {
    %c0_i32 = arith.constant 0 : i32
    %c0_i32_0 = arith.constant 0 : i32
    %c0_i32_1 = arith.constant 0 : i32
    return %arg0, %c0_i32, %c0_i32_0 : i32, i32, i32
  }
  func.func @transform_1(%arg0: i32, %arg1: memref<2xi32, #tpu.memory_space<smem>>) -> (i32, i32, i32) {
    %c0_i32 = arith.constant 0 : i32
    %c0_i32_0 = arith.constant 0 : i32
    %c0_i32_1 = arith.constant 0 : i32
    return %arg0, %c0_i32, %c0_i32_0 : i32, i32, i32
  }
  func.func @transform_2(%arg0: i32, %arg1: memref<2xi32, #tpu.memory_space<smem>>) -> (i32, i32, i32) {
    %c0_i32 = arith.constant 0 : i32
    %c0_i32_0 = arith.constant 0 : i32
    %c0_i32_1 = arith.constant 0 : i32
    return %arg0, %c0_i32, %c0_i32_0 : i32, i32, i32
  }
}

</mosaic_0001>

<bundles_post_ra>
// kernel: tpu_custom_call.1
= control target key start
LH: loop header
LB: loop body
LE: loop exit
PB: predicated region body
PF: predicated region fallthrough
CT: control target
= control target key end

     0   :  { %s2096_s0 = inlined_call_operand.vmem [shape: s32[2], index: 0, kind: input, shape index: {}]   ;;  %s2097_s1 = inlined_call_operand.vmem [shape: f32[2,32,16], index: 1, kind: input, shape index: {}]   ;;  %s2098_s2 = inlined_call_operand.vmem [shape: s32[2,10,16], index: 2, kind: input, shape index: {}]   ;;  %s2099_s3 = inlined_call_operand.vmem [shape: f32[1,2,1], index: 3, kind: output, shape index: {}]  }
   0x1   :  { %s8_s14 = sshll.u32 %s2096_s0, 4  ;;  %s9_s14 = int_to_ptr.vmem [resolvable:$true] %s8_s14 }
   0x2   :  { %s1164_s15 = scalar_lea.vmem %s9_s14, 16  ;;  %p1169_p1 = scmp.lt.s32.totalorder %s9_s14, %s9_s14 }
   0x3   :  { %p1165_p0 = scmp.ne.s32.totalorder %s9_s14, %s1164_s15  ;;  %p1170_p2 = scmp.lt.s32.totalorder %s1164_s15, %s1164_s15 }
   0x5   :  { %p1171_p3 = por %p1170_p2, %p1169_p1 }
   0x7   :  { %p1172_p4 = pnand %p1171_p3, %p1165_p0 }
   0x9   :  { %1175 = shalt.err (!%p1172_p4)  }
   0xa   :  { %s1178_s16 = smov [#allocation3]  }
   0xb   :  { %11 = dma.vmem_to_smem %s9_s14, 16, %s1178_s16, [#allocation2] }
   0xc   :  { %1176 = dma.done.wait [#allocation2], 16 }
   0xd   :  { %1177 = vsyncadd [#allocation2], 4294967280 }
   0xe   :  { %13 = sfence }
   0xf   :  { %v18_v0 = vlaneseq  ;;  %vm2100_vm0 = vcmask 130048   ;;  %v1206_v1 = vld [vmem:[%s2097_s1 + $0x20] sm:$0xff]  ;;  %v1211_v2 = vld [vmem:[%s2097_s1 + $0x28] sm:$0xff]  ;;  %v1179_v3 = vmov 1966171168   ;;  %v1219_v6 = vld [vmem:[%s2097_s1 + $0x30] sm:$0xff] }
  0x10   :  { %v85_v4 = vunpack.c.l.s4 %v1179_v3  ;;  %v1224_v7 = vld [vmem:[%s2097_s1 + $0x38] sm:$0xff]  ;;  %v538_v9 = vsel %vm2100_vm0, %v1206_v1, -inf  ;;  %v539_v10 = vsel %vm2100_vm0, %v1211_v2, -inf  ;;  %v1041_v11 = vld [vmem:[%s2098_s2 + $0x10] sm:$0xff]  ;;  %v540_v13 = vsel %vm2100_vm0, %v1219_v6, -inf  ;;  %v1245_v22 = vld [vmem:[%s2097_s1] sm:$0xff] }
  0x11   :  { %v1214_v5 = vshrl.u32 %v18_v0, 7  ;;  %v541_v14 = vsel %vm2100_vm0, %v1224_v7, -inf  ;;  %v542_v15 = vmax.f32 %v538_v9, %v539_v10  ;;  %v592_v17 = vcombine.high %v1041_v11, %v1041_v11  ;;  %v1250_v23 = vld [vmem:[%s2097_s1 + $0x8] sm:$0xff]  ;;  %v1255_v25 = vld [vmem:[%s2097_s1 + $0x10] sm:$0xff]  ;;  %v1260_v26 = vld [vmem:[%s2097_s1 + $0x18] sm:$0xff]  ;;  %s1484_s9 = sld [smem:[#allocation3 + $0x1]] }
  0x12   :  { %v86_v8 = vunpack.c.0.s8 %v85_v4  ;;  %v543_v16 = vmax.f32 %v540_v13, %v541_v14  ;;  %v30_v29 = vsel %vm2100_vm0, %v1245_v22, -inf  ;;  %v31_v30 = vsel %vm2100_vm0, %v1250_v23, -inf  ;;  %v81_v39 = vld [vmem:[%s2098_s2] sm:$0xff]  ;;  %s1933_s12 = sld [smem:[#allocation3]] }
  0x13   :  { %v32_v33 = vsel %vm2100_vm0, %v1255_v25, -inf  ;;  %v33_v34 = vsel %vm2100_vm0, %v1260_v26, -inf  ;;  %v1273_v36 = vsub.s32 0, %v1214_v5  ;;  %v34_v41 = vmax.f32 %v30_v29, %v31_v30 }
  0x14   :  { %v1234_v12 = vsub.s32 %v86_v8, %v1214_v5  ;;  %v544_v19 = vmax.f32 %v542_v15, %v543_v16  ;;  %v35_v42 = vmax.f32 %v32_v33, %v33_v34  ;;  %v83_v43 = vcombine.high %v81_v39, %v81_v39 }
  0x15   :  { %v1281_v46 = vadd.s32 8, %v1214_v5  ;;  %v1284_v47 = vadd.s32 16, %v1214_v5  ;;  %v1287_v48 = vadd.s32 24, %v1214_v5 }
  0x16   :  { %v599_v18 = vrot.slane %v1041_v11, %v1234_v12  ;;  %v606_v20 = vrot.slane %v592_v17, %v1234_v12  ;;  %v545_v24 = vrot.slane %v544_v19, 4  ;;  %v1291_v53 = vrot.slane %v81_v39, %v1234_v12 }
  0x17   :  { %v1296_v56 = vmax.f32 %v34_v41, %v35_v42  ;;  %v1299_v57 = vrot.slane %v83_v43, %v1234_v12  ;;  %p581_p5 = scmp.gt.s32.totalorder %s1484_s9, 1 }
  0x18   :  { %v607_v21 = vcombine.high %v599_v18, %v599_v18  ;;  %v608_v27 = vcombine.high %v606_v20, %v606_v20  ;;  %v546_v28 = vmax.f32 %v544_v19, %v545_v24  ;;  %v615_v31 = vrot.slane %v599_v18, %v1234_v12  ;;  %p73_p6 = scmp.gt.s32.totalorder %s1933_s12, 1 }
  0x19   :  { %v622_v37 = vrot.slane %v606_v20, %v1234_v12  ;;  %s2210_s9 = smov (!%p581_p5, %s1484_s9), 1 }
  0x1a   :  { %v629_v32 = vrot.slane %v607_v21, %v1234_v12  ;;  %v547_v35 = vrot.slane %v546_v28, 2  ;;  %v636_v38 = vrot.slane %v608_v27, %v1234_v12  ;;  %v637_v44 = vcombine.high %v615_v31, %v615_v31  ;;  %s2212_s12 = smov (!%p73_p6, %s1933_s12), 1 }
  0x1b   :  { %v638_v50 = vcombine.high %v622_v37, %v622_v37  ;;  %v666_v52 = vrot.slane %v615_v31, %v1273_v36  ;;  %v682_v60 = vrot.slane %v622_v37, %v1273_v36  ;;  %s75_s21 = scvt.s32.f32 %s2212_s12 }
  0x1c   :  { %v548_v40 = vmax.f32 %v546_v28, %v547_v35  ;;  %v639_v45 = vcombine.high %v629_v32, %v629_v32  ;;  %v640_v51 = vcombine.high %v636_v38, %v636_v38  ;;  %v670_v55 = vrot.slane %v629_v32, %v1273_v36 }
  0x1d   :  { %v674_v58 = vrot.slane %v637_v44, %v1273_v36  ;;  %v1305_v61 = vrot.slane %v636_v38, %v1273_v36  ;;  %v1316_v8 = vrot.slane %v638_v50, %v1273_v36  ;;  %vm703_vm1 = vcmp.eq.s32.totalorder %v1214_v5, %v666_v52 }
  0x1e   :  { %v549_v49 = vrot.slane %v548_v40, 1  ;;  %v678_v59 = vrot.slane %v639_v45, %v1273_v36  ;;  %v1319_v9 = vrot.slane %v640_v51, %v1273_v36  ;;  %vm704_vm2 = vcmp.eq.s32.totalorder %v1281_v46, %v666_v52 }
  0x1f   :  { %vm705_vm3 = vcmp.eq.s32.totalorder %v1284_v47, %v666_v52  ;;  %vm706_vm4 = vcmp.eq.s32.totalorder %v1287_v48, %v666_v52  ;;  %vm707_vm5 = vcmp.eq.s32.totalorder %v1214_v5, %v670_v55  ;;  %vm708_vm6 = vcmp.eq.s32.totalorder %v1281_v46, %v670_v55 }
  0x20   :  { %v1293_v54 = vmax.f32 %v548_v40, %v549_v49  ;;  %vm709_vm7 = vcmp.eq.s32.totalorder %v1284_v47, %v670_v55  ;;  %vm714_vm12 = vcmp.eq.s32.totalorder %v1287_v48, %v674_v58  ;;  %vm715_vm13 = vcmp.eq.s32.totalorder %v1214_v5, %v678_v59 }
  0x21   :  { %vm716_vm14 = vcmp.eq.s32.totalorder %v1281_v46, %v678_v59  ;;  %vm717_vm15 = vcmp.eq.s32.totalorder %v1284_v47, %v678_v59  ;;  %vm718_vm0 = vcmp.eq.s32.totalorder %v1287_v48, %v678_v59  ;;  %vm719_vm8 = vcmp.eq.s32.totalorder %v1214_v5, %v682_v60 }
  0x22   :  { %v551_v62 = vsub.f32 %v1206_v1, %v1293_v54  ;;  %v552_v63 = vsub.f32 %v1211_v2, %v1293_v54  ;;  %v553_v3 = vsub.f32 %v1219_v6, %v1293_v54  ;;  %v554_v4 = vsub.f32 %v1224_v7, %v1293_v54 }
  0x23   :  { %vm720_vm9 = vcmp.eq.s32.totalorder %v1281_v46, %v682_v60  ;;  %vm721_vm10 = vcmp.eq.s32.totalorder %v1284_v47, %v682_v60  ;;  %vm722_vm11 = vcmp.eq.s32.totalorder %v1287_v48, %v682_v60  ;;  %v743_v15 = vsel %vm703_vm1, %v1206_v1, 0.0 }
  0x24   :  { %v555_v10 = vmul.f32 1.442695, %v551_v62  ;;  %v557_v11 = vmul.f32 1.442695, %v552_v63  ;;  %v559_v13 = vmul.f32 1.442695, %v553_v3  ;;  %vm2101_vm1 = vcmp.eq.s32.totalorder %v1287_v48, %v670_v55 }
  0x25   :  { %v561_v14 = vmul.f32 1.442695, %v554_v4  ;;  %v744_v16 = vsel %vm704_vm2, %v1211_v2, 0.0  ;;  %v745_v17 = vsel %vm705_vm3, %v1219_v6, 0.0  ;;  %v746_v18 = vsel %vm706_vm4, %v1224_v7, 0.0 }
  0x26   :  { %1052 = vpow2.f32 %v555_v10  ;;  %v747_v19 = vsel %vm707_vm5, %v1206_v1, 0.0  ;;  %v748_v20 = vsel %vm708_vm6, %v1211_v2, 0.0  ;;  %v749_v21 = vsel %vm709_vm7, %v1219_v6, 0.0 }
  0x27   :  { %1054 = vpow2.f32 %v557_v11  ;;  %v750_v24 = vsel %vm2101_vm1, %v1224_v7, 0.0  ;;  %vm2102_vm2 = vcmp.eq.s32.totalorder %v1214_v5, %v674_v58  ;;  %vm2103_vm3 = vcmp.eq.s32.totalorder %v1281_v46, %v674_v58 }
  0x28   :  { %1056 = vpow2.f32 %v559_v13  ;;  %v751_v27 = vsel %vm2102_vm2, %v1206_v1, 0.0  ;;  %v752_v28 = vsel %vm2103_vm3, %v1211_v2, 0.0  ;;  %vm723_vm4 = vcmp.eq.s32.totalorder %v1214_v5, %v1305_v61 }
  0x29   :  { %1058 = vpow2.f32 %v561_v14  ;;  %vm724_vm5 = vcmp.eq.s32.totalorder %v1281_v46, %v1305_v61  ;;  %vm2104_vm6 = vcmp.eq.s32.totalorder %v1284_v47, %v674_v58  ;;  %v754_v30 = vsel %vm714_vm12, %v1224_v7, 0.0 }
  0x2a   :  { %v753_v29 = vsel %vm2104_vm6, %v1219_v6, 0.0  ;;  %v755_v31 = vsel %vm715_vm13, %v1206_v1, 0.0  ;;  %v756_v32 = vsel %vm716_vm14, %v1211_v2, 0.0  ;;  %vm725_vm7 = vcmp.eq.s32.totalorder %v1284_v47, %v1305_v61 }
  0x2b   :  { %v757_v33 = vsel %vm717_vm15, %v1219_v6, 0.0  ;;  %v758_v34 = vsel %vm718_vm0, %v1224_v7, 0.0  ;;  %v759_v35 = vsel %vm719_vm8, %v1206_v1, 0.0  ;;  %v760_v37 = vsel %vm720_vm9, %v1211_v2, 0.0 }
  0x2c   :  { %vm726_vm12 = vcmp.eq.s32.totalorder %v1287_v48, %v1305_v61  ;;  %v761_v38 = vsel %vm721_vm10, %v1219_v6, 0.0  ;;  %v762_v39 = vsel %vm722_vm11, %v1224_v7, 0.0  ;;  %vm2105_vm0 = vcmask 130048  }
  0x2d   :  { %v783_v40 = vsel %vm2105_vm0, %v743_v15, 0.0  ;;  %vm2106_vm13 = vmmov %vm2105_vm0  ;;  %vm727_vm15 = vcmp.eq.s32.totalorder %v1214_v5, %v1316_v8  ;;  %vm728_vm3 = vcmp.eq.s32.totalorder %v1281_v46, %v1316_v8  ;;  %vm729_vm6 = vcmp.eq.s32.totalorder %v1284_v47, %v1316_v8 }
  0x2e   :  { %v784_v41 = vsel %vm2106_vm13, %v744_v16, 0.0  ;;  %vm2107_vm8 = vmmov %vm2105_vm0  ;;  %v810_v59 = vsel %vm2105_vm0, %v752_v28, 0.0  ;;  %v768_v61 = vsel %vm728_vm3, %v1211_v2, 0.0 }
  0x2f   :  { %v785_v42 = vadd.f32 %v784_v41, %v783_v40  ;;  %v786_v43 = vsel %vm2107_vm8, %v745_v17, 0.0  ;;  %vm2108_vm14 = vmmov %vm2105_vm0  ;;  %vm730_vm8 = vcmp.eq.s32.totalorder %v1287_v48, %v1316_v8  ;;  %v763_v41 = vsel %vm723_vm4, %v1206_v1, 0.0 }
  0x30   :  { %v788_v44 = vsel %vm2108_vm14, %v746_v18, 0.0  ;;  %vm2109_vm9 = vmmov %vm2105_vm0 }
  0x31   :  { %v796_v45 = vsel %vm2109_vm9, %v747_v19, 0.0  ;;  %vm2110_vm1 = vmmov %vm2105_vm0  ;;  %v787_v55 = vadd.f32 %v786_v43, %v785_v42  ;;  %v764_v42 = vsel %vm724_vm5, %v1211_v2, 0.0 }
  0x32   :  { %v797_v49 = vsel %vm2110_vm1, %v748_v20, 0.0  ;;  %vm2111_vm10 = vmmov %vm2105_vm0  ;;  %v825_v20 = vsel %vm2105_vm0, %v757_v33, 0.0 }
  0x33   :  { %v799_v50 = vsel %vm2111_vm10, %v749_v21, 0.0  ;;  %vm2112_vm2 = vmmov %vm2105_vm0  ;;  %v798_v58 = vadd.f32 %v797_v49, %v796_v45  ;;  %v1053_v62 = vpop.eup %1052  ;;  %v789_v14 = vadd.f32 %v788_v44, %v787_v55  ;;  %v765_v44 = vsel %vm725_vm7, %v1219_v6, 0.0 }
  0x34   :  { %v801_v51 = vsel %vm2112_vm2, %v750_v24, 0.0  ;;  %vm2113_vm11 = vmmov %vm2105_vm0  ;;  %v1055_v11 = vpop.eup %1054 }
  0x35   :  { %v809_v52 = vsel %vm2113_vm11, %v751_v27, 0.0  ;;  %vm2114_vm13 = vmmov %vm2105_vm0  ;;  %v800_v15 = vadd.f32 %v799_v50, %v798_v58  ;;  %v1057_v17 = vpop.eup %1056  ;;  %vm731_vm11 = vcmp.eq.s32.totalorder %v1214_v5, %v1319_v9 }
  0x36   :  { %v812_v60 = vsel %vm2114_vm13, %v753_v29, 0.0  ;;  %v811_v63 = vadd.f32 %v810_v59, %v809_v52  ;;  %vm2115_vm14 = vmmov %vm2105_vm0  ;;  %v1059_v24 = vpop.eup %1058  ;;  %v790_v29 = vrot.slane %v789_v14, 4 }
  0x37   :  { %v814_v3 = vsel %vm2115_vm14, %v754_v30, 0.0  ;;  %vm2116_vm9 = vmmov %vm2105_vm0  ;;  %v802_v30 = vadd.f32 %v801_v51, %v800_v15  ;;  %v766_v51 = vsel %vm726_vm12, %v1224_v7, 0.0 }
  0x38   :  { %v822_v4 = vsel %vm2116_vm9, %v755_v31, 0.0  ;;  %vm2117_vm1 = vmmov %vm2105_vm0  ;;  %v813_v19 = vadd.f32 %v812_v60, %v811_v63  ;;  %vm732_vm9 = vcmp.eq.s32.totalorder %v1281_v46, %v1319_v9  ;;  %v791_v52 = vadd.f32 %v790_v29, %v789_v14 }
  0x39   :  { %v823_v10 = vsel %vm2117_vm1, %v756_v32, 0.0  ;;  %vm2118_vm10 = vmmov %vm2105_vm0  ;;  %vm733_vm1 = vcmp.eq.s32.totalorder %v1284_v47, %v1319_v9  ;;  %v803_v58 = vrot.slane %v802_v30, 4  ;;  %v772_v8 = vsel %vm732_vm9, %v1211_v2, 0.0 }
  0x3a   :  { %v563_v13 = vsel %vm2118_vm10, %v1053_v62, 0.0  ;;  %v824_v16 = vadd.f32 %v823_v10, %v822_v4  ;;  %vm2119_vm2 = vmmov %vm2105_vm0  ;;  %v815_v32 = vadd.f32 %v814_v3, %v813_v19  ;;  %v792_v14 = vrot.slane %v791_v52, 2 }
  0x3b   :  { %v564_v18 = vsel %vm2119_vm2, %v1055_v11, 0.0  ;;  %vm2120_vm13 = vmmov %vm2105_vm0  ;;  %vm734_vm2 = vcmp.eq.s32.totalorder %v1287_v48, %v1319_v9 }
  0x3c   :  { %v827_v21 = vsel %vm2120_vm13, %v758_v34, 0.0  ;;  %v565_v27 = vadd.f32 %v564_v18, %v563_v13  ;;  %vm2121_vm14 = vmmov %vm2105_vm0  ;;  %v826_v33 = vadd.f32 %v825_v20, %v824_v16  ;;  %v835_v34 = vsel %vm2105_vm0, %v759_v35, 0.0 }
  0x3d   :  { %v566_v28 = vsel %vm2121_vm14, %v1057_v17, 0.0  ;;  %vm2122_vm10 = vmmov %vm2105_vm0  ;;  %v770_v13 = vsel %vm730_vm8, %v1224_v7, 0.0  ;;  %v804_v16 = vadd.f32 %v803_v58, %v802_v30 }
  0x3e   :  { %v568_v31 = vsel %vm2122_vm10, %v1059_v24, 0.0  ;;  %v567_v40 = vadd.f32 %v566_v28, %v565_v27  ;;  %vm2123_vm13 = vmmov %vm2105_vm0  ;;  %v828_v45 = vadd.f32 %v827_v21, %v826_v33  ;;  %v771_v21 = vsel %vm731_vm11, %v1206_v1, 0.0 }
  0x3f   :  { %v836_v43 = vsel %vm2123_vm13, %v760_v37, 0.0  ;;  %vm2124_vm14 = vmmov %vm2105_vm0  ;;  %v816_v37 = vrot.slane %v815_v32, 4  ;;  %v773_v28 = vsel %vm733_vm1, %v1219_v6, 0.0  ;;  %v805_v2 = vrot.slane %v804_v16, 2 }
  0x40   :  { %v837_v35 = vadd.f32 %v836_v43, %v835_v34  ;;  %v838_v49 = vsel %vm2124_vm14, %v761_v38, 0.0  ;;  %v569_v50 = vadd.f32 %v568_v31, %v567_v40  ;;  %vm2125_vm4 = vmmov %vm2105_vm0  ;;  %v767_v38 = vsel %vm727_vm15, %v1206_v1, 0.0 }
  0x41   :  { %v840_v55 = vsel %vm2125_vm4, %v762_v39, 0.0  ;;  %vm2126_vm5 = vmmov %vm2105_vm0  ;;  %v829_v63 = vrot.slane %v828_v45, 4  ;;  %v769_v39 = vsel %vm729_vm6, %v1219_v6, 0.0  ;;  %v817_v17 = vadd.f32 %v816_v37, %v815_v32 }
  0x42   :  { %v839_v59 = vadd.f32 %v838_v49, %v837_v35  ;;  %v848_v60 = vsel %vm2126_vm5, %v763_v41, 0.0  ;;  %v570_v62 = vrot.slane %v569_v50, 4  ;;  %vm2127_vm7 = vmmov %vm2105_vm0  ;;  %v774_v1 = vsel %vm734_vm2, %v1224_v7, 0.0 }
  0x43   :  { %v849_v3 = vsel %vm2127_vm7, %v764_v42, 0.0  ;;  %vm2128_vm12 = vmmov %vm2105_vm0  ;;  %v830_v24 = vadd.f32 %v829_v63, %v828_v45  ;;  %v793_v34 = vadd.f32 %v792_v14, %v791_v52  ;;  %v818_v40 = vrot.slane %v817_v17, 2  ;;  %v1516_v63 = vld.sshfl [vmem:[%s2098_s2 + $0x18] sm:$0x11 pattern:$0x75316420] }
  0x44   :  { %v841_v4 = vadd.f32 %v840_v55, %v839_v59  ;;  %v850_v10 = vadd.f32 %v849_v3, %v848_v60  ;;  %v571_v11 = vadd.f32 %v570_v62, %v569_v50  ;;  %v851_v15 = vsel %vm2128_vm12, %v765_v44, 0.0  ;;  %vm2129_vm15 = vmmov %vm2105_vm0 }
  0x45   :  { %v853_v27 = vsel %vm2129_vm15, %v766_v51, 0.0  ;;  %vm2130_vm3 = vmmov %vm2105_vm0  ;;  %v831_v43 = vrot.slane %v830_v24, 2  ;;  %v806_v55 = vadd.f32 %v805_v2, %v804_v16  ;;  %v819_v58 = vadd.f32 %v818_v40, %v817_v17 }
  0x46   :  { %v842_v18 = vrot.slane %v841_v4, 4  ;;  %v852_v19 = vadd.f32 %v851_v15, %v850_v10  ;;  %v572_v20 = vrot.slane %v571_v11, 2  ;;  %v861_v32 = vsel %vm2130_vm3, %v767_v38, 0.0  ;;  %vm2131_vm6 = vmmov %vm2105_vm0 }
  0x47   :  { %v862_v33 = vsel %vm2131_vm6, %v768_v61, 0.0  ;;  %vm2132_vm8 = vmmov %vm2105_vm0  ;;  %v37_v38 = vrot.slane %v1296_v56, 4  ;;  %v1519_v3 = vand.u32 127, %v18_v0  ;;  %v832_v61 = vadd.f32 %v831_v43, %v830_v24 }
  0x48   :  { %v843_v29 = vadd.f32 %v842_v18, %v841_v4  ;;  %v854_v30 = vadd.f32 %v853_v27, %v852_v19  ;;  %v573_v31 = vadd.f32 %v572_v20, %v571_v11  ;;  %v863_v6 = vadd.f32 %v862_v33, %v861_v32  ;;  %vm2133_vm11 = vmmov %vm2105_vm0 }
  0x49   :  { %v864_v44 = vsel %vm2132_vm8, %v769_v39, 0.0  ;;  %v866_v49 = vsel %vm2133_vm11, %v770_v13, 0.0  ;;  %vm2134_vm9 = vmmov %vm2105_vm0  ;;  %v38_v13 = vmax.f32 %v1296_v56, %v37_v38  ;;  %v98_v14 = vcombine.high %v1291_v53, %v1291_v53 }
  0x4a   :  { %v855_v41 = vrot.slane %v854_v30, 4  ;;  %v574_v42 = vrot.slane %v573_v31, 1  ;;  %v844_v45 = vrot.slane %v843_v29, 2  ;;  %v874_v7 = vsel %vm2134_vm9, %v771_v21, 0.0  ;;  %vm2135_vm1 = vmmov %vm2105_vm0 }
  0x4b   :  { %v865_v50 = vadd.f32 %v864_v44, %v863_v6  ;;  %v875_v51 = vsel %vm2135_vm1, %v772_v8, 0.0  ;;  %vm2136_vm10 = vmmov %vm2105_vm0  ;;  %v794_v15 = vrot.slane %v793_v34, 1  ;;  %v99_v0 = vcombine.high %v1299_v57, %v1299_v57 }
  0x4c   :  { %v856_v35 = vadd.f32 %v855_v41, %v854_v30  ;;  %v575_v9 = vadd.f32 %v574_v42, %v573_v31  ;;  %v877_v52 = vsel %vm2136_vm10, %v773_v28, 0.0  ;;  %v876_v59 = vadd.f32 %v875_v51, %v874_v7  ;;  %vm2137_vm2 = vmmov %vm2105_vm0 }
  0x4d   :  { %v867_v60 = vadd.f32 %v866_v49, %v865_v50  ;;  %v879_v62 = vsel %vm2137_vm2, %v774_v1, 0.0  ;;  %v845_v39 = vadd.f32 %v844_v45, %v843_v29  ;;  %v648_v17 = vcombine.high %v1516_v63, %v1516_v63 }
  0x4e   :  { %v857_v37 = vrot.slane %v856_v35, 2  ;;  %1060 = vlog2.f32 %v575_v9  ;;  %v878_v4 = vadd.f32 %v877_v52, %v876_v59  ;;  %v807_v18 = vrot.slane %v806_v55, 1 }
  0x4f   :  { %v868_v11 = vrot.slane %v867_v60, 4  ;;  %v820_v19 = vrot.slane %v819_v58, 1  ;;  %v39_v21 = vrot.slane %v38_v13, 2  ;;  %v833_v56 = vrot.slane %v832_v61, 1 }
  0x50   :  { %v858_v10 = vadd.f32 %v857_v37, %v856_v35  ;;  %v880_v16 = vadd.f32 %v879_v62, %v878_v4  ;;  %v846_v24 = vrot.slane %v845_v39, 1  ;;  %v106_v8 = vrot.slane %v1291_v53, %v1234_v12 }
  0x51   :  { %v869_v20 = vadd.f32 %v868_v11, %v867_v60  ;;  %v40_v30 = vmax.f32 %v38_v13, %v39_v21  ;;  %v120_v31 = vrot.slane %v98_v14, %v1234_v12  ;;  %v587_v1 = vstv %s2210_s9 }
  0x52   :  { %v881_v27 = vrot.slane %v880_v16, 4  ;;  %v859_v28 = vrot.slane %v858_v10, 1  ;;  %v113_v33 = vrot.slane %v1299_v57, %v1234_v12  ;;  %v127_v2 = vrot.slane %v99_v0, %v1234_v12 }
  0x53   :  { %v870_v29 = vrot.slane %v869_v20, 2  ;;  %v795_v40 = vadd.f32 %v794_v15, %v793_v34  ;;  %v808_v41 = vadd.f32 %v807_v18, %v806_v55  ;;  %v41_v43 = vrot.slane %v40_v30, 1 }
  0x54   :  { %v882_v32 = vadd.f32 %v881_v27, %v880_v16  ;;  %v821_v6 = vadd.f32 %v820_v19, %v819_v58  ;;  %v834_v44 = vadd.f32 %v833_v56, %v832_v61  ;;  %v128_v53 = vcombine.high %v106_v8, %v106_v8 }
  0x55   :  { %v871_v42 = vadd.f32 %v870_v29, %v869_v20  ;;  %v847_v35 = vadd.f32 %v846_v24, %v845_v39  ;;  %v860_v49 = vadd.f32 %v859_v28, %v858_v10  ;;  %v1540_v7 = vmax.f32 %v40_v30, %v41_v43 }
  0x56   :  { %v883_v45 = vrot.slane %v882_v32, 2  ;;  %v130_v9 = vcombine.high %v120_v31, %v120_v31  ;;  %v129_v52 = vcombine.high %v113_v33, %v113_v33  ;;  %v131_v37 = vcombine.high %v127_v2, %v127_v2 }
  0x57   :  { %v872_v50 = vrot.slane %v871_v42, 1  ;;  %v43_v57 = vsub.f32 %v1245_v22, %v1540_v7  ;;  %v44_v34 = vsub.f32 %v1250_v23, %v1540_v7  ;;  %v45_v55 = vsub.f32 %v1255_v25, %v1540_v7 }
  0x58   :  { %v884_v51 = vadd.f32 %v883_v45, %v882_v32  ;;  %v1549_v58 = vrot.slane %v106_v8, %v1273_v36  ;;  %v46_v62 = vsub.f32 %v1260_v26, %v1540_v7  ;;  %v1554_v38 = vrot.slane %v120_v31, %v1273_v36 }
  0x59   :  { %v1557_v61 = vrot.slane %v128_v53, %v1273_v36  ;;  %v47_v4 = vmul.f32 1.442695, %v43_v57  ;;  %v49_v10 = vmul.f32 1.442695, %v44_v34  ;;  %v1560_v11 = vrot.slane %v130_v9, %v1273_v36 }
  0x5a   :  { %v885_v60 = vrot.slane %v884_v51, 1  ;;  %v873_v13 = vadd.f32 %v872_v50, %v871_v42  ;;  %v1563_v15 = vrot.slane %v113_v33, %v1273_v36  ;;  %v1566_v16 = vrot.slane %v127_v2, %v1273_v36 }
  0x5b   :  { %v1061_v59 = vpop.eup %1060  ;;  %1062 = vpow2.f32 %v47_v4  ;;  %v51_v18 = vmul.f32 1.442695, %v45_v55  ;;  %v1572_v19 = vrot.slane %v129_v52, %v1273_v36  ;;  %v53_v20 = vmul.f32 1.442695, %v46_v62 }
  0x5c   :  { %v577_v39 = vmul.f32 0.6931472, %v1061_v59  ;;  %v886_v14 = vadd.f32 %v885_v60, %v884_v51  ;;  %1064 = vpow2.f32 %v49_v10  ;;  %v1575_v21 = vrot.slane %v131_v37, %v1273_v36 }
  0x5d   :  { %vm194_vm0 = vcmp.eq.s32.totalorder %v1214_v5, %v1549_v58  ;;  %vm195_vm13 = vcmp.eq.s32.totalorder %v1281_v46, %v1549_v58  ;;  %vm196_vm14 = vcmp.eq.s32.totalorder %v1284_v47, %v1549_v58  ;;  %vm197_vm4 = vcmp.eq.s32.totalorder %v1287_v48, %v1549_v58 }
  0x5e   :  { %v1569_v0 = vadd.f32 %v577_v39, %v1293_v54  ;;  %vm198_vm5 = vcmp.eq.s32.totalorder %v1214_v5, %v1554_v38  ;;  %vm199_vm7 = vcmp.eq.s32.totalorder %v1281_v46, %v1554_v38  ;;  %vm200_vm12 = vcmp.eq.s32.totalorder %v1284_v47, %v1554_v38 }
  0x5f   :  { %1066 = vpow2.f32 %v51_v18  ;;  %vm201_vm15 = vcmp.eq.s32.totalorder %v1287_v48, %v1554_v38  ;;  %vm202_vm3 = vcmp.eq.s32.totalorder %v1214_v5, %v1557_v61  ;;  %vm203_vm6 = vcmp.eq.s32.totalorder %v1281_v46, %v1557_v61 }
  0x60   :  { %v913_v56 = vsub.f32 %v795_v40, %v1569_v0  ;;  %v914_v24 = vsub.f32 %v808_v41, %v1569_v0  ;;  %v915_v54 = vsub.f32 %v821_v6, %v1569_v0  ;;  %v916_v27 = vsub.f32 %v834_v44, %v1569_v0 }
  0x61   :  { %v917_v8 = vsub.f32 %v847_v35, %v1569_v0  ;;  %v918_v28 = vsub.f32 %v860_v49, %v1569_v0  ;;  %v919_v29 = vsub.f32 %v873_v13, %v1569_v0  ;;  %v920_v30 = vsub.f32 %v886_v14, %v1569_v0 }
  0x62   :  { %v923_v31 = vmul.f32 1.442695, %v913_v56  ;;  %v925_v32 = vmul.f32 1.442695, %v914_v24  ;;  %v927_v33 = vmul.f32 1.442695, %v915_v54  ;;  %1068 = vpow2.f32 %v53_v20 }
  0x63   :  { %v929_v2 = vmul.f32 1.442695, %v916_v27  ;;  %v931_v40 = vmul.f32 1.442695, %v917_v8  ;;  %v933_v41 = vmul.f32 1.442695, %v918_v28  ;;  %vm218_vm8 = vcmp.eq.s32.totalorder %v1214_v5, %v1572_v19 }
  0x64   :  { %1070 = vpow2.f32 %v923_v31  ;;  %v935_v42 = vmul.f32 1.442695, %v919_v29  ;;  %v937_v43 = vmul.f32 1.442695, %v920_v30  ;;  %vm219_vm1 = vcmp.eq.s32.totalorder %v1281_v46, %v1572_v19 }
  0x65   :  { %1072 = vpow2.f32 %v925_v32  ;;  %vm222_vm11 = vcmp.eq.s32.totalorder %v1214_v5, %v1575_v21  ;;  %vm223_vm9 = vcmp.eq.s32.totalorder %v1281_v46, %v1575_v21  ;;  %v1649_v6 = vsel %vm194_vm0, %v1245_v22, 0.0 }
  0x66   :  { %1074 = vpow2.f32 %v927_v33  ;;  %vm224_vm10 = vcmp.eq.s32.totalorder %v1284_v47, %v1575_v21  ;;  %vm225_vm2 = vcmp.eq.s32.totalorder %v1287_v48, %v1575_v21  ;;  %v1659_v45 = vsel %vm195_vm13, %v1250_v23, 0.0 }
  0x67   :  { %1076 = vpow2.f32 %v929_v2  ;;  %v1665_v53 = vsel %vm196_vm14, %v1255_v25, 0.0  ;;  %v1671_v35 = vsel %vm197_vm4, %v1260_v26, 0.0  ;;  %vm2138_vm0 = vcmask 130048  }
  0x68   :  { %1078 = vpow2.f32 %v931_v40  ;;  %v1063_v44 = vpop.eup %1062  ;;  %v1678_v50 = vsel %vm198_vm5, %v1245_v22, 0.0  ;;  %v1684_v51 = vsel %vm199_vm7, %v1250_v23, 0.0  ;;  %v1690_v52 = vsel %vm200_vm12, %v1255_v25, 0.0  ;;  %vm2139_vm13 = vmmov %vm2138_vm0 }
  0x69   :  { %1080 = vpow2.f32 %v933_v41  ;;  %v1065_v49 = vpop.eup %1064  ;;  %v55_v9 = vsel %vm2138_vm0, %v1063_v44, 0.0  ;;  %v1697_v57 = vsel %vm201_vm15, %v1260_v26, 0.0  ;;  %v1703_v34 = vsel %vm202_vm3, %v1245_v22, 0.0 }
  0x6a   :  { %1082 = vpow2.f32 %v935_v42  ;;  %v56_v37 = vsel %vm2139_vm13, %v1065_v49, 0.0  ;;  %v1709_v55 = vsel %vm203_vm6, %v1250_v23, 0.0  ;;  %vm2140_vm14 = vcmp.eq.s32.totalorder %v1284_v47, %v1557_v61  ;;  %vm2147_vm6 = vmmov %vm2138_vm0 }
  0x6b   :  { %1084 = vpow2.f32 %v937_v43  ;;  %v57_v58 = vadd.f32 %v56_v37, %v55_v9  ;;  %v1715_v59 = vsel %vm2140_vm14, %v1255_v25, 0.0  ;;  %vm2141_vm4 = vcmp.eq.s32.totalorder %v1287_v48, %v1557_v61 }
  0x6c   :  { %v1721_v60 = vsel %vm2141_vm4, %v1260_v26, 0.0  ;;  %vm2142_vm5 = vcmp.eq.s32.totalorder %v1214_v5, %v1560_v11  ;;  %v1067_v38 = vpop.eup %1066  ;;  %vm2143_vm7 = vcmp.eq.s32.totalorder %v1281_v46, %v1560_v11  ;;  %vm2144_vm12 = vcmp.eq.s32.totalorder %v1284_v47, %v1560_v11  ;;  %vm2151_vm4 = vmmov %vm2147_vm6 }
  0x6d   :  { %v1727_v62 = vsel %vm2142_vm5, %v1245_v22, 0.0  ;;  %v1733_v39 = vsel %vm2143_vm7, %v1250_v23, 0.0  ;;  %v1739_v61 = vsel %vm2144_vm12, %v1255_v25, 0.0  ;;  %vm2145_vm15 = vcmp.eq.s32.totalorder %v1287_v48, %v1560_v11 }
  0x6e   :  { %v1745_v4 = vsel %vm2145_vm15, %v1260_v26, 0.0  ;;  %vm2146_vm3 = vcmp.eq.s32.totalorder %v1214_v5, %v1563_v15  ;;  %v58_v14 = vsel %vm2147_vm6, %v1067_v38, 0.0  ;;  %vm2148_vm0 = vcmp.eq.s32.totalorder %v1281_v46, %v1563_v15 }
  0x6f   :  { %v1751_v10 = vsel %vm2146_vm3, %v1245_v22, 0.0  ;;  %v1069_v13 = vpop.eup %1068  ;;  %v1758_v18 = vsel %vm2148_vm0, %v1250_v23, 0.0  ;;  %vm2149_vm13 = vcmp.eq.s32.totalorder %v1284_v47, %v1563_v15  ;;  %vm2150_vm14 = vcmp.eq.s32.totalorder %v1287_v48, %v1563_v15 }
  0x70   :  { %v1764_v11 = vsel %vm2149_vm13, %v1255_v25, 0.0  ;;  %v1770_v20 = vsel %vm2150_vm14, %v1260_v26, 0.0  ;;  %v59_v24 = vadd.f32 %v58_v14, %v57_v58  ;;  %v60_v54 = vsel %vm2151_vm4, %v1069_v13, 0.0 }
  0x71   :  { %v1071_v56 = vpop.eup %1070  ;;  %vm2152_vm5 = vcmp.eq.s32.totalorder %v1214_v5, %v1566_v16  ;;  %vm2153_vm7 = vcmp.eq.s32.totalorder %v1281_v46, %v1566_v16  ;;  %vm2154_vm12 = vcmp.eq.s32.totalorder %v1284_v47, %v1566_v16  ;;  %vm2155_vm15 = vcmp.eq.s32.totalorder %v1287_v48, %v1566_v16 }
  0x72   :  { %v1777_v27 = vsel %vm2152_vm5, %v1245_v22, 0.0  ;;  %v1783_v8 = vsel %vm2153_vm7, %v1250_v23, 0.0  ;;  %v1073_v28 = vpop.eup %1072  ;;  %v943_v15 = vadd.f32 1e-07, %v1071_v56  ;;  %v1789_v29 = vsel %vm2154_vm12, %v1255_v25, 0.0 }
  0x73   :  { %v1795_v30 = vsel %vm2155_vm15, %v1260_v26, 0.0  ;;  %v1801_v31 = vsel %vm218_vm8, %v1245_v22, 0.0  ;;  %v1075_v32 = vpop.eup %1074  ;;  %v944_v33 = vadd.f32 1e-07, %v1073_v28  ;;  %v61_v2 = vadd.f32 %v60_v54, %v59_v24 }
  0x74   :  { %v1807_v40 = vsel %vm219_vm1, %v1250_v23, 0.0  ;;  %vm2156_vm3 = vcmp.eq.s32.totalorder %v1284_v47, %v1572_v19  ;;  %v1077_v41 = vpop.eup %1076  ;;  %v945_v42 = vadd.f32 1e-07, %v1075_v32  ;;  %1086 = vlog2.f32 %v943_v15  ;;  %vm2160_vm1 = vmmov %vm2151_vm4 }
  0x75   :  { %v1813_v16 = vsel %vm2156_vm3, %v1255_v25, 0.0  ;;  %vm2157_vm8 = vcmp.eq.s32.totalorder %v1287_v48, %v1572_v19  ;;  %v1825_v44 = vsel %vm222_vm11, %v1245_v22, 0.0  ;;  %v1079_v49 = vpop.eup %1078  ;;  %v946_v9 = vadd.f32 1e-07, %v1077_v41  ;;  %vm2158_vm11 = vmmov %vm2151_vm4 }
  0x76   :  { %v1819_v43 = vsel %vm2157_vm8, %v1260_v26, 0.0  ;;  %1088 = vlog2.f32 %v944_v33  ;;  %v62_v37 = vrot.slane %v61_v2, 4  ;;  %v1831_v58 = vsel %vm223_vm9, %v1250_v23, 0.0  ;;  %v1081_v38 = vpop.eup %1080  ;;  %vm2159_vm9 = vmmov %vm2151_vm4 }
  0x77   :  { %v947_v19 = vadd.f32 1e-07, %v1079_v49  ;;  %1090 = vlog2.f32 %v945_v42  ;;  %v1837_v13 = vsel %vm224_vm10, %v1255_v25, 0.0  ;;  %v1843_v22 = vsel %vm225_vm2, %v1260_v26, 0.0  ;;  %v1083_v14 = vpop.eup %1082  ;;  %vm2161_vm10 = vmmov %vm2160_vm1 }
  0x78   :  { %v948_v56 = vadd.f32 1e-07, %v1081_v38  ;;  %1092 = vlog2.f32 %v946_v9  ;;  %v63_v23 = vadd.f32 %v62_v37, %v61_v2  ;;  %v274_v24 = vsel %vm2158_vm11, %v1649_v6, 0.0  ;;  %v1085_v54 = vpop.eup %1084  ;;  %vm2162_vm2 = vmmov %vm2160_vm1 }
  0x79   :  { %v949_v28 = vadd.f32 1e-07, %v1083_v14  ;;  %1094 = vlog2.f32 %v947_v19  ;;  %v275_v25 = vsel %vm2159_vm9, %v1659_v45, 0.0  ;;  %v277_v15 = vsel %vm2160_vm1, %v1665_v53, 0.0  ;;  %vm2163_vm6 = vmmov %vm2160_vm1 }
  0x7a   :  { %v950_v32 = vadd.f32 1e-07, %v1085_v54  ;;  %1096 = vlog2.f32 %v948_v56  ;;  %v64_v26 = vrot.slane %v63_v23, 2  ;;  %v276_v21 = vadd.f32 %v275_v25, %v274_v24  ;;  %vm2164_vm13 = vmmov %vm2160_vm1 }
  0x7b   :  { %1098 = vlog2.f32 %v949_v28  ;;  %v279_v33 = vsel %vm2161_vm10, %v1671_v35, 0.0  ;;  %v287_v6 = vsel %vm2162_vm2, %v1678_v50, 0.0  ;;  %v288_v2 = vsel %vm2163_vm6, %v1684_v51, 0.0  ;;  %vm2165_vm14 = vmmov %vm2160_vm1 }
  0x7c   :  { %1100 = vlog2.f32 %v950_v32  ;;  %v65_v41 = vadd.f32 %v64_v26, %v63_v23  ;;  %v278_v45 = vadd.f32 %v277_v15, %v276_v21  ;;  %v289_v42 = vadd.f32 %v288_v2, %v287_v6  ;;  %vm2166_vm4 = vmmov %vm2160_vm1 }
  0x7d   :  { %vm477_vm0 = vcmask 1041409   ;;  %v290_v53 = vsel %vm2164_vm13, %v1690_v52, 0.0  ;;  %v292_v49 = vsel %vm2165_vm14, %v1697_v57, 0.0  ;;  %v300_v35 = vsel %vm2166_vm4, %v1703_v34, 0.0  ;;  %vm2167_vm5 = vmmov %vm2160_vm1 }
  0x7e   :  { %v301_v50 = vsel %vm2167_vm5, %v1709_v55, 0.0  ;;  %vm480_vm7 = vcmask 1042434   ;;  %v66_v9 = vrot.slane %v65_v41, 1  ;;  %v280_v51 = vadd.f32 %v279_v33, %v278_v45  ;;  %vm2168_vm15 = vmmov %vm2160_vm1 }
  0x7f   :  { %v291_v37 = vadd.f32 %v290_v53, %v289_v42  ;;  %v302_v38 = vadd.f32 %v301_v50, %v300_v35  ;;  %vm483_vm12 = vcmask 1043459   ;;  %v303_v19 = vsel %vm2168_vm15, %v1715_v59, 0.0  ;;  %vm2169_vm3 = vmmov %vm2160_vm1 }
  0x80   :  { %v305_v52 = vsel %vm2169_vm3, %v1721_v60, 0.0  ;;  %vm2170_vm8 = vmmov %vm2160_vm1  ;;  %vm486_vm9 = vcmask 1044484   ;;  %v67_v55 = vadd.f32 %v66_v9, %v65_v41  ;;  %v281_v14 = vrot.slane %v280_v51, 4 }
  0x81   :  { %v313_v57 = vsel %vm2170_vm8, %v1727_v62, 0.0  ;;  %vm2171_vm11 = vmmov %vm2160_vm1  ;;  %v293_v56 = vadd.f32 %v292_v49, %v291_v37  ;;  %v304_v23 = vadd.f32 %v303_v19, %v302_v38  ;;  %vm489_vm1 = vcmask 1045509   ;;  %v1087_v62 = vpop.eup %1086 }
  0x82   :  { %v314_v34 = vsel %vm2171_vm11, %v1733_v39, 0.0  ;;  %vm2172_vm10 = vmmov %vm2162_vm2  ;;  %v318_v59 = vsel %vm2162_vm2, %v1745_v4, 0.0  ;;  %vm492_vm13 = vcmask 1046534   ;;  %1102 = vlog2.f32 %v67_v55 }
  0x83   :  { %v315_v24 = vadd.f32 %v314_v34, %v313_v57  ;;  %v316_v54 = vsel %vm2172_vm10, %v1739_v61, 0.0  ;;  %vm2173_vm6 = vmmov %vm2162_vm2  ;;  %v282_v39 = vadd.f32 %v281_v14, %v280_v51  ;;  %v294_v28 = vrot.slane %v293_v56, 4  ;;  %v1089_v15 = vpop.eup %1088 }
  0x84   :  { %v326_v60 = vsel %vm2173_vm6, %v1751_v10, 0.0  ;;  %v306_v25 = vadd.f32 %v305_v52, %v304_v23  ;;  %vm495_vm14 = vcmask 1047559   ;;  %v954_v32 = vmul.f32 0.6931472, %v1087_v62  ;;  %vm2174_vm4 = vmmov %vm2162_vm2  ;;  %v1091_v4 = vpop.eup %1090 }
  0x85   :  { %v317_v26 = vadd.f32 %v316_v54, %v315_v24  ;;  %v327_v61 = vsel %vm2174_vm4, %v1758_v18, 0.0  ;;  %vm2175_vm5 = vmmov %vm2162_vm2  ;;  %vm1886_vm15 = vcmp.lt.s32.totalorder %v1519_v3, %v587_v1  ;;  %v956_v33 = vmul.f32 0.6931472, %v1089_v15  ;;  %v1093_v45 = vpop.eup %1092 }
  0x86   :  { %v329_v21 = vsel %vm2175_vm5, %v1764_v11, 0.0  ;;  %v283_v6 = vrot.slane %v282_v39, 2  ;;  %v295_v2 = vadd.f32 %v294_v28, %v293_v56  ;;  %v307_v41 = vrot.slane %v306_v25, 4  ;;  %vm2178_vm3 = vmmov %vm2162_vm2  ;;  %v1095_v35 = vpop.eup %1094 }
  0x87   :  { %v958_v42 = vmul.f32 0.6931472, %v1091_v4  ;;  %v319_v53 = vadd.f32 %v318_v59, %v317_v26  ;;  %v328_v49 = vadd.f32 %v327_v61, %v326_v60  ;;  %v331_v18 = vsel %vm2178_vm3, %v1770_v20, 0.0  ;;  %v1097_v1 = vpop.eup %1096  ;;  %vm2179_vm8 = vmmov %vm2162_vm2 }
  0x88   :  { %v960_v11 = vmul.f32 0.6931472, %v1093_v45  ;;  %v985_v50 = vrot.slane %v956_v33, 7  ;;  %v284_v9 = vadd.f32 %v283_v6, %v282_v39  ;;  %v296_v51 = vrot.slane %v295_v2, 2  ;;  %v1099_v57 = vpop.eup %1098  ;;  %vm2180_vm11 = vmmov %vm2162_vm2 }
  0x89   :  { %v962_v37 = vmul.f32 0.6931472, %v1095_v35  ;;  %v987_v38 = vrot.slane %v958_v42, 6  ;;  %v308_v19 = vadd.f32 %v307_v41, %v306_v25  ;;  %v320_v52 = vrot.slane %v319_v53, 4  ;;  %v1101_v23 = vpop.eup %1100  ;;  %vm2181_vm10 = vmmov %vm2162_vm2 }
  0x8a   :  { %v964_v34 = vmul.f32 0.6931472, %v1097_v1  ;;  %v986_v55 = vsel %vm477_vm0, %v985_v50, %v954_v32  ;;  %v989_v14 = vrot.slane %v960_v11, 5  ;;  %v285_v56 = vrot.slane %v284_v9, 1  ;;  %vm2182_vm6 = vmmov %vm2162_vm2 }
  0x8b   :  { %v966_v24 = vmul.f32 0.6931472, %v1099_v57  ;;  %v988_v20 = vsel %vm480_vm7, %v987_v38, %v986_v55  ;;  %v991_v54 = vrot.slane %v962_v37, 4  ;;  %v297_v59 = vadd.f32 %v296_v51, %v295_v2  ;;  %vm2183_vm4 = vmmov %vm2162_vm2 }
  0x8c   :  { %v968_v60 = vmul.f32 0.6931472, %v1101_v23  ;;  %v990_v62 = vsel %vm483_vm12, %v989_v14, %v988_v20  ;;  %v993_v39 = vrot.slane %v964_v34, 3  ;;  %v286_v28 = vadd.f32 %v285_v56, %v284_v9  ;;  %vm2184_vm5 = vmmov %vm2162_vm2 }
  0x8d   :  { %v992_v25 = vsel %vm486_vm9, %v991_v54, %v990_v62  ;;  %v995_v15 = vrot.slane %v966_v24, 2  ;;  %v298_v26 = vrot.slane %v297_v59, 1  ;;  %v309_v61 = vrot.slane %v308_v19, 2  ;;  %vm2185_vm3 = vmmov %vm2162_vm2 }
  0x8e   :  { %v994_v32 = vsel %vm489_vm1, %v993_v39, %v992_v25  ;;  %v997_v4 = vrot.slane %v968_v60, 1  ;;  %v321_v33 = vadd.f32 %v320_v52, %v319_v53  ;;  %v330_v6 = vadd.f32 %v329_v21, %v328_v49 }
  0x8f   :  { %v996_v41 = vsel %vm492_vm13, %v995_v15, %v994_v32  ;;  %v299_v45 = vadd.f32 %v298_v26, %v297_v59  ;;  %v310_v42 = vadd.f32 %v309_v61, %v308_v19  ;;  %v339_v2 = vsel %vm2179_vm8, %v1777_v27, 0.0  ;;  %v1103_v51 = vpop.eup %1102  ;;  %vm2186_vm8 = vmmov %vm2162_vm2 }
  0x90   :  { %v998_v35 = vsel %vm495_vm14, %v997_v4, %v996_v41  ;;  %v322_v11 = vrot.slane %v321_v33, 2  ;;  %v332_v50 = vadd.f32 %v331_v18, %v330_v6  ;;  %v340_v9 = vsel %vm2180_vm11, %v1783_v8, 0.0  ;;  %vm2187_vm11 = vmmov %vm2162_vm2 }
  0x91   :  { %v1003_v1 = vsel %vm1886_vm15, %v998_v35, 0.0  ;;  %v311_v53 = vrot.slane %v310_v42, 1  ;;  %v341_v21 = vadd.f32 %v340_v9, %v339_v2  ;;  %v342_v49 = vsel %vm2181_vm10, %v1789_v29, 0.0  ;;  %vm2188_vm10 = vmmov %vm2162_vm2 }
  0x92   :  { %v1005_v37 = vsel %vm2162_vm2, %v1003_v1, 0.0  ;;  %v69_v38 = vmul.f32 0.6931472, %v1103_v51  ;;  %v323_v27 = vadd.f32 %v322_v11, %v321_v33  ;;  %v333_v19 = vrot.slane %v332_v50, 4 }
  0x93   :  { %1006 = vadd.xlane.f32.xlu1 %v1005_v37  ;;  %v312_v52 = vadd.f32 %v311_v53, %v310_v42  ;;  %v343_v18 = vadd.f32 %v342_v49, %v341_v21  ;;  %v344_v8 = vsel %vm2182_vm6, %v1795_v30, 0.0  ;;  %v352_v57 = vsel %vm2183_vm4, %v1801_v31, 0.0  ;;  %vm2189_vm6 = vmmov %vm2162_vm2  ;;  %v1938_v11 = vld.sshfl [vmem:[%s2098_s2 + $0x8] sm:$0x11 pattern:$0x75316420] }
  0x94   :  { %v1913_v34 = vadd.f32 %v69_v38, %v1540_v7  ;;  %v324_v55 = vrot.slane %v323_v27, 1  ;;  %v334_v14 = vadd.f32 %v333_v19, %v332_v50  ;;  %v353_v29 = vsel %vm2184_vm5, %v1807_v40, 0.0 }
  0x95   :  { %v345_v56 = vadd.f32 %v344_v8, %v343_v18  ;;  %v354_v23 = vadd.f32 %v353_v29, %v352_v57  ;;  %v355_v24 = vsel %vm2185_vm3, %v1813_v16, 0.0  ;;  %v357_v20 = vsel %vm2186_vm8, %v1819_v43, 0.0 }
  0x96   :  { %v325_v30 = vadd.f32 %v324_v55, %v323_v27  ;;  %v335_v54 = vrot.slane %v334_v14, 2  ;;  %v365_v31 = vsel %vm2187_vm11, %v1825_v44, 0.0  ;;  %v366_v7 = vsel %vm2188_vm10, %v1831_v58, 0.0 }
  0x97   :  { %v346_v59 = vrot.slane %v345_v56, 4  ;;  %v356_v60 = vadd.f32 %v355_v24, %v354_v23  ;;  %v367_v62 = vadd.f32 %v366_v7, %v365_v31  ;;  %v368_v40 = vsel %vm2162_vm2, %v1837_v13, 0.0  ;;  %v1157_v24 = vld [vmem:[%s2097_s1 + $0x28] sm:$0xff]  ;;  %v1159_v31 = vld [vmem:[%s2097_s1 + $0x38] sm:$0xff] }
  0x98   :  { %v336_v39 = vadd.f32 %v335_v54, %v334_v14  ;;  %v370_v16 = vsel %vm2189_vm6, %v1843_v22, 0.0  ;;  %v404_v43 = vsub.f32 %v286_v28, %v1913_v34  ;;  %v405_v25 = vsub.f32 %v299_v45, %v1913_v34 }
  0x99   :  { %v347_v15 = vadd.f32 %v346_v59, %v345_v56  ;;  %v358_v26 = vadd.f32 %v357_v20, %v356_v60  ;;  %v369_v44 = vadd.f32 %v368_v40, %v367_v62  ;;  %v406_v61 = vsub.f32 %v312_v52, %v1913_v34  ;;  %v1156_v56 = vld [vmem:[%s2097_s1 + $0x20] sm:$0xff] }
  0x9a   :  { %v337_v58 = vrot.slane %v336_v39, 1  ;;  %v407_v32 = vsub.f32 %v325_v30, %v1913_v34  ;;  %v414_v4 = vmul.f32 1.442695, %v404_v43  ;;  %v416_v33 = vmul.f32 1.442695, %v405_v25  ;;  %v1158_v30 = vld [vmem:[%s2097_s1 + $0x30] sm:$0xff] }
  0x9b   :  { %v348_v6 = vrot.slane %v347_v15, 2  ;;  %v359_v13 = vrot.slane %v358_v26, 4  ;;  %v371_v41 = vadd.f32 %v370_v16, %v369_v44  ;;  %v418_v42 = vmul.f32 1.442695, %v406_v61 }
  0x9c   :  { %v338_v22 = vadd.f32 %v337_v58, %v336_v39  ;;  %1104 = vpow2.f32 %v414_v4  ;;  %v420_v28 = vmul.f32 1.442695, %v407_v32  ;;  %v655_v9 = vrot.slane %v1516_v63, %v1234_v12 }
  0x9d   :  { %v349_v45 = vadd.f32 %v348_v6, %v347_v15  ;;  %v360_v2 = vadd.f32 %v359_v13, %v358_v26  ;;  %v372_v35 = vrot.slane %v371_v41, 4  ;;  %1106 = vpow2.f32 %v416_v33 }
  0x9e   :  { %v408_v50 = vsub.f32 %v338_v22, %v1913_v34  ;;  %1108 = vpow2.f32 %v418_v42  ;;  %v662_v51 = vrot.slane %v648_v17, %v1234_v12  ;;  %v698_v37 = vrot.slane %v655_v9, %v1273_v36 }
  0x9f   :  { %v350_v1 = vrot.slane %v349_v45, 1  ;;  %v361_v53 = vrot.slane %v360_v2, 2  ;;  %v373_v21 = vadd.f32 %v372_v35, %v371_v41  ;;  %1110 = vpow2.f32 %v420_v28 }
  0xa0   :  { %v422_v49 = vmul.f32 1.442695, %v408_v50  ;;  %v702_v38 = vrot.slane %v662_v51, %v1273_v36  ;;  %v139_v27 = vcombine.high %v1938_v11, %v1938_v11  ;;  %v146_v63 = vrot.slane %v1938_v11, %v1234_v12 }
  0xa1   :  { %v351_v19 = vadd.f32 %v350_v1, %v349_v45  ;;  %v362_v52 = vadd.f32 %v361_v53, %v360_v2  ;;  %v374_v18 = vrot.slane %v373_v21, 2  ;;  %vm735_vm4 = vcmp.eq.s32.totalorder %v1214_v5, %v698_v37 }
  0xa2   :  { %1112 = vpow2.f32 %v422_v49  ;;  %vm736_vm5 = vcmp.eq.s32.totalorder %v1281_v46, %v698_v37  ;;  %vm737_vm3 = vcmp.eq.s32.totalorder %v1284_v47, %v698_v37  ;;  %vm738_vm8 = vcmp.eq.s32.totalorder %v1287_v48, %v698_v37 }
  0xa3   :  { %v363_v17 = vrot.slane %v362_v52, 1  ;;  %v375_v8 = vadd.f32 %v374_v18, %v373_v21  ;;  %v409_v57 = vsub.f32 %v351_v19, %v1913_v34  ;;  %vm739_vm11 = vcmp.eq.s32.totalorder %v1214_v5, %v702_v38 }
  0xa4   :  { %vm740_vm10 = vcmp.eq.s32.totalorder %v1281_v46, %v702_v38  ;;  %vm741_vm2 = vcmp.eq.s32.totalorder %v1284_v47, %v702_v38  ;;  %vm742_vm6 = vcmp.eq.s32.totalorder %v1287_v48, %v702_v38  ;;  %v775_v23 = vsel %vm735_vm4, %v1156_v56, 0.0 }
  0xa5   :  { %v364_v55 = vadd.f32 %v363_v17, %v362_v52  ;;  %v376_v14 = vrot.slane %v375_v8, 1  ;;  %v424_v29 = vmul.f32 1.442695, %v409_v57  ;;  %v776_v20 = vsel %vm736_vm5, %v1157_v24, 0.0 }
  0xa6   :  { %v777_v54 = vsel %vm737_vm3, %v1158_v30, 0.0  ;;  %v778_v7 = vsel %vm738_vm8, %v1159_v31, 0.0  ;;  %v779_v59 = vsel %vm739_vm11, %v1156_v56, 0.0  ;;  %v780_v40 = vsel %vm740_vm10, %v1157_v24, 0.0 }
  0xa7   :  { %v377_v60 = vadd.f32 %v376_v14, %v375_v8  ;;  %v410_v62 = vsub.f32 %v364_v55, %v1913_v34  ;;  %1114 = vpow2.f32 %v424_v29  ;;  %v781_v39 = vsel %vm741_vm2, %v1158_v30, 0.0  ;;  %v1161_v55 = vld [vmem:[%s2097_s1 + $0x8] sm:$0xff]  ;;  %v1162_v29 = vld [vmem:[%s2097_s1 + $0x10] sm:$0xff] }
  0xa8   :  { %v782_v16 = vsel %vm742_vm6, %v1159_v31, 0.0  ;;  %vm2190_vm4 = vcmask 130048   ;;  %v153_v21 = vrot.slane %v139_v27, %v1234_v12  ;;  %v189_v49 = vrot.slane %v146_v63, %v1273_v36  ;;  %v1160_v63 = vld [vmem:[%s2097_s1] sm:$0xff] }
  0xa9   :  { %v887_v43 = vsel %vm2190_vm4, %v775_v23, 0.0  ;;  %vm2191_vm5 = vmmov %vm2190_vm4  ;;  %v1105_v15 = vpop.eup %1104  ;;  %v411_v26 = vsub.f32 %v377_v60, %v1913_v34  ;;  %v426_v44 = vmul.f32 1.442695, %v410_v62  ;;  %v2015_v19 = vstv %s75_s21 }
  0xaa   :  { %v888_v25 = vsel %vm2191_vm5, %v776_v20, 0.0  ;;  %vm2192_vm3 = vmmov %vm2190_vm4  ;;  %v1107_v32 = vpop.eup %1106  ;;  %v434_v4 = vadd.f32 1e-07, %v1105_v15  ;;  %v193_v17 = vrot.slane %v153_v21, %v1273_v36  ;;  %vm226_vm4 = vcmp.eq.s32.totalorder %v1214_v5, %v189_v49  ;;  %v1163_v20 = vld [vmem:[%s2097_s1 + $0x18] sm:$0xff]  ;;  %s583_s1 = scvt.s32.f32 %s2210_s9 }
  0xab   :  { %v889_v61 = vadd.f32 %v888_v25, %v887_v43  ;;  %v890_v58 = vsel %vm2192_vm3, %v777_v54, 0.0  ;;  %vm2193_vm8 = vmmov %vm2192_vm3  ;;  %v1109_v41 = vpop.eup %1108  ;;  %1116 = vpow2.f32 %v426_v44  ;;  %v428_v42 = vmul.f32 1.442695, %v411_v26 }
  0xac   :  { %v892_v33 = vsel %vm2193_vm8, %v778_v7, 0.0  ;;  %vm2194_vm11 = vmmov %vm2192_vm3  ;;  %v435_v22 = vadd.f32 1e-07, %v1107_v32  ;;  %v1111_v45 = vpop.eup %1110  ;;  %v436_v2 = vadd.f32 1e-07, %v1109_v41  ;;  %1118 = vlog2.f32 %v434_v4 }
  0xad   :  { %v900_v6 = vsel %vm2194_vm11, %v779_v59, 0.0  ;;  %vm2195_vm10 = vmmov %vm2192_vm3  ;;  %v891_v28 = vadd.f32 %v890_v58, %v889_v61  ;;  %1120 = vpow2.f32 %v428_v42  ;;  %v437_v9 = vadd.f32 1e-07, %v1111_v45 }
  0xae   :  { %v901_v13 = vsel %vm2195_vm10, %v780_v40, 0.0  ;;  %vm2196_vm2 = vmmov %vm2192_vm3  ;;  %1122 = vlog2.f32 %v435_v22  ;;  %vm227_vm5 = vcmp.eq.s32.totalorder %v1281_v46, %v189_v49  ;;  %vm228_vm3 = vcmp.eq.s32.totalorder %v1284_v47, %v189_v49 }
  0xaf   :  { %v902_v35 = vadd.f32 %v901_v13, %v900_v6  ;;  %v903_v50 = vsel %vm2196_vm2, %v781_v39, 0.0  ;;  %v893_v51 = vadd.f32 %v892_v33, %v891_v28  ;;  %vm2197_vm6 = vmmov %vm2196_vm2  ;;  %v1113_v37 = vpop.eup %1112  ;;  %1124 = vlog2.f32 %v436_v2 }
  0xb0   :  { %v905_v1 = vsel %vm2197_vm6, %v782_v16, 0.0  ;;  %v438_v52 = vadd.f32 1e-07, %v1113_v37  ;;  %1126 = vlog2.f32 %v437_v9  ;;  %vm229_vm8 = vcmp.eq.s32.totalorder %v1287_v48, %v189_v49 }
  0xb1   :  { %v904_v53 = vadd.f32 %v903_v50, %v902_v35  ;;  %v894_v38 = vrot.slane %v893_v51, 4  ;;  %vm230_vm11 = vcmp.eq.s32.totalorder %v1214_v5, %v193_v17  ;;  %vm231_vm10 = vcmp.eq.s32.totalorder %v1281_v46, %v193_v17 }
  0xb2   :  { %1128 = vlog2.f32 %v438_v52  ;;  %vm232_vm2 = vcmp.eq.s32.totalorder %v1284_v47, %v193_v17  ;;  %vm233_vm6 = vcmp.eq.s32.totalorder %v1287_v48, %v193_v17  ;;  %v266_v57 = vsel %vm226_vm4, %v1160_v63, 0.0 }
  0xb3   :  { %v906_v18 = vadd.f32 %v905_v1, %v904_v53  ;;  %v895_v8 = vadd.f32 %v894_v38, %v893_v51  ;;  %v267_v14 = vsel %vm227_vm5, %v1161_v55, 0.0  ;;  %v268_v56 = vsel %vm228_vm3, %v1162_v29, 0.0 }
  0xb4   :  { %v1115_v36 = vpop.eup %1114  ;;  %v269_v30 = vsel %vm229_vm8, %v1163_v20, 0.0  ;;  %v270_v54 = vsel %vm230_vm11, %v1160_v63, 0.0  ;;  %v271_v7 = vsel %vm231_vm10, %v1161_v55, 0.0  ;;  %v272_v59 = vsel %vm232_vm2, %v1162_v29, 0.0 }
  0xb5   :  { %v907_v12 = vrot.slane %v906_v18, 4  ;;  %v896_v11 = vrot.slane %v895_v8, 2  ;;  %v439_v23 = vadd.f32 1e-07, %v1115_v36  ;;  %v273_v60 = vsel %vm233_vm6, %v1163_v20, 0.0 }
  0xb6   :  { %vm2198_vm4 = vcmask 130048  }
  0xb7   :  { %v908_v27 = vadd.f32 %v907_v12, %v906_v18  ;;  %v897_v24 = vadd.f32 %v896_v11, %v895_v8  ;;  %1130 = vlog2.f32 %v439_v23  ;;  %v378_v40 = vsel %vm2198_vm4, %v266_v57, 0.0  ;;  %vm2199_vm5 = vmmov %vm2198_vm4 }
  0xb8   :  { %v379_v39 = vsel %vm2199_vm5, %v267_v14, 0.0  ;;  %v1117_v16 = vpop.eup %1116  ;;  %vm2200_vm3 = vmmov %vm2198_vm4  ;;  %v584_v14 = vstv %s583_s1 }
  0xb9   :  { %v909_v31 = vrot.slane %v908_v27, 2  ;;  %v898_v62 = vrot.slane %v897_v24, 1  ;;  %v380_v5 = vadd.f32 %v379_v39, %v378_v40  ;;  %v381_v25 = vsel %vm2200_vm3, %v268_v56, 0.0  ;;  %vm2201_vm8 = vmmov %vm2200_vm3  ;;  %v1119_v15 = vpop.eup %1118 }
  0xba   :  { %v383_v46 = vsel %vm2201_vm8, %v269_v30, 0.0  ;;  %v440_v26 = vadd.f32 1e-07, %v1117_v16  ;;  %vm2202_vm11 = vmmov %vm2200_vm3  ;;  %v1121_v61 = vpop.eup %1120  ;;  %v445_v58 = vmul.f32 0.6931472, %v1119_v15 }
  0xbb   :  { %v910_v43 = vadd.f32 %v909_v31, %v908_v27  ;;  %v899_v47 = vadd.f32 %v898_v62, %v897_v24  ;;  %v391_v44 = vsel %vm2202_vm11, %v270_v54, 0.0  ;;  %vm2203_vm10 = vmmov %vm2200_vm3  ;;  %v382_v4 = vadd.f32 %v381_v25, %v380_v5  ;;  %v1123_v6 = vpop.eup %1122 }
  0xbc   :  { %v392_v48 = vsel %vm2203_vm10, %v271_v7, 0.0  ;;  %v441_v13 = vadd.f32 1e-07, %v1121_v61  ;;  %1132 = vlog2.f32 %v440_v26  ;;  %vm2204_vm2 = vmmov %vm2200_vm3  ;;  %v1125_v22 = vpop.eup %1124  ;;  %v447_v28 = vmul.f32 0.6931472, %v1123_v6 }
  0xbd   :  { %v911_v32 = vrot.slane %v910_v43, 1  ;;  %v393_v33 = vadd.f32 %v392_v48, %v391_v44  ;;  %v921_v41 = vsub.f32 %v899_v47, %v1569_v0  ;;  %v394_v42 = vsel %vm2204_vm2, %v272_v59, 0.0  ;;  %v1127_v50 = vpop.eup %1126  ;;  %vm2205_vm6 = vmmov %vm2204_vm2 }
  0xbe   :  { %v384_v2 = vadd.f32 %v383_v46, %v382_v4  ;;  %v449_v9 = vmul.f32 0.6931472, %v1125_v22  ;;  %1134 = vlog2.f32 %v441_v13  ;;  %v396_v1 = vsel %vm2205_vm6, %v273_v60, 0.0 }
  0xbf   :  { %v912_v45 = vadd.f32 %v911_v32, %v910_v43  ;;  %v395_v35 = vadd.f32 %v394_v42, %v393_v33  ;;  %v939_v51 = vmul.f32 1.442695, %v921_v41  ;;  %v451_v53 = vmul.f32 0.6931472, %v1127_v50  ;;  %v1129_v38 = vpop.eup %1128 }
  0xc0   :  { %v476_v21 = vrot.slane %v447_v28, 7  ;;  %v385_v37 = vrot.slane %v384_v2, 4  ;;  %v479_v52 = vrot.slane %v449_v9, 6  ;;  %v453_v17 = vmul.f32 0.6931472, %v1129_v38 }
  0xc1   :  { %v922_v49 = vsub.f32 %v912_v45, %v1569_v0  ;;  %1136 = vpow2.f32 %v939_v51  ;;  %v397_v18 = vadd.f32 %v396_v1, %v395_v35  ;;  %v482_v12 = vrot.slane %v451_v53, 5 }
  0xc2   :  { %v478_v8 = vsel %vm477_vm0, %v476_v21, %v445_v58  ;;  %v386_v27 = vadd.f32 %v385_v37, %v384_v2  ;;  %1138 = vrcp.f32 %v2015_v19  ;;  %v485_v0 = vrot.slane %v453_v17, 4 }
  0xc3   :  { %v941_v11 = vmul.f32 1.442695, %v922_v49  ;;  %v481_v36 = vsel %vm480_vm7, %v479_v52, %v478_v8  ;;  %v398_v63 = vrot.slane %v397_v18, 4  ;;  %v79_v19 = vstv %s2212_s12 }
  0xc4   :  { %v387_v57 = vrot.slane %v386_v27, 2  ;;  %v1131_v29 = vpop.eup %1130  ;;  %v484_v56 = vsel %vm483_vm12, %v482_v12, %v481_v36  ;;  %vm2070_vm7 = vcmp.lt.s32.totalorder %v1519_v3, %v79_v19  ;;  %vm2208_vm12 = vmmov %vm2204_vm2 }
  0xc5   :  { %1140 = vpow2.f32 %v941_v11  ;;  %v399_v55 = vadd.f32 %v398_v63, %v397_v18  ;;  %v455_v23 = vmul.f32 0.6931472, %v1131_v29  ;;  %v487_v30 = vsel %vm486_vm9, %v485_v0, %v484_v56 }
  0xc6   :  { %1142 = vrcp.f32 %v584_v14  ;;  %v388_v24 = vadd.f32 %v387_v57, %v386_v27  ;;  %vm506_vm9 = vcmask 123904  }
  0xc7   :  { %v400_v20 = vrot.slane %v399_v55, 2  ;;  %v488_v54 = vrot.slane %v455_v23, 3 }
  0xc8   :  { %v389_v31 = vrot.slane %v388_v24, 1 }
  0xc9   :  { %v401_v7 = vadd.f32 %v400_v20, %v399_v55  ;;  %v1133_v59 = vpop.eup %1132  ;;  %v490_v16 = vsel %vm489_vm1, %v488_v54, %v487_v30  ;;  %vm515_vm1 = vcmask 1042432  }
  0xca   :  { %v457_v60 = vmul.f32 0.6931472, %v1133_v59  ;;  %v390_v62 = vadd.f32 %v389_v31, %v388_v24 }
  0xcb   :  { %v402_v40 = vrot.slane %v401_v7, 1  ;;  %v1135_v39 = vpop.eup %1134 }
  0xcc   :  { %v459_v43 = vmul.f32 0.6931472, %v1135_v39  ;;  %v491_v5 = vrot.slane %v457_v60, 2  ;;  %v412_v46 = vsub.f32 %v390_v62, %v1913_v34 }
  0xcd   :  { %v403_v25 = vadd.f32 %v402_v40, %v401_v7 }
  0xce   :  { %v1137_v15 = vpop.eup %1136  ;;  %v493_v47 = vsel %vm492_vm13, %v491_v5, %v490_v16  ;;  %v494_v44 = vrot.slane %v459_v43, 1  ;;  %v430_v32 = vmul.f32 1.442695, %v412_v46  ;;  %vm523_vm13 = vcmask 4096  }
  0xcf   :  { %v951_v48 = vadd.f32 1e-07, %v1137_v15  ;;  %v413_v61 = vsub.f32 %v403_v25, %v1913_v34  ;;  %v1139_v58 = vpop.eup %1138 }
  0xd0   :  { %v496_v33 = vsel %vm495_vm14, %v494_v44, %v493_v47  ;;  %1044 = vpush %v1139_v58 }
  0xd1   :  { %1144 = vlog2.f32 %v951_v48  ;;  %v432_v6 = vmul.f32 1.442695, %v413_v61  ;;  %v501_v3 = vsel %vm2070_vm7, %v496_v33, 0.0 }
  0xd2   :  { %v1141_v4 = vpop.eup %1140  ;;  %1146 = vpow2.f32 %v430_v32  ;;  %v503_v42 = vsel %vm2208_vm12, %v501_v3, 0.0 }
  0xd3   :  { %v952_v13 = vadd.f32 1e-07, %v1141_v4  ;;  %v1143_v41 = vpop.eup %1142  ;;  %1148 = vpow2.f32 %v432_v6  ;;  %504 = vadd.xlane.f32.xlu0 %v503_v42 }
  0xd4   :  { %1046 = vpush %v1143_v41 }
  0xd5   :  { %1150 = vlog2.f32 %v952_v13 }
  0xde   :  { %v1145_v34 = vpop.eup %1144 }
  0xdf   :  { %v1147_v22 = vpop.eup %1146  ;;  %v970_v50 = vmul.f32 0.6931472, %v1145_v34 }
  0xe0   :  { %v1149_v28 = vpop.eup %1148  ;;  %v442_v45 = vadd.f32 1e-07, %v1147_v22 }
  0xe1   :  { %v443_v35 = vadd.f32 1e-07, %v1149_v28 }
  0xe2   :  { %v1151_v2 = vpop.eup %1150  ;;  %1152 = vlog2.f32 %v442_v45 }
  0xe3   :  { %v972_v9 = vmul.f32 0.6931472, %v1151_v2  ;;  %1154 = vlog2.f32 %v443_v35 }
  0xe5   :  { %v999_v51 = vrot.slane %v972_v9, 7 }
  0xe7   :  { %v1000_v1 = vsel %vm477_vm0, %v999_v51, %v970_v50 }
  0xe8   :  { %v1004_v53 = vsel %vm1886_vm15, %v1000_v1, 0.0 }
  0xe9   :  { %v1008_v21 = vsel %vm506_vm9, %v1004_v53, 0.0 }
  0xea   :  { %1009 = vadd.xlane.f32.xlu1 %v1008_v21 }
  0xef   :  { %v1153_v49 = vpop.eup %1152 }
  0xf0   :  { %v1155_v37 = vpop.eup %1154  ;;  %v461_v38 = vmul.f32 0.6931472, %v1153_v49 }
  0xf1   :  { %v463_v52 = vmul.f32 0.6931472, %v1155_v37 }
  0xf3   :  { %v497_v18 = vrot.slane %v463_v52, 7 }
  0xf5   :  { %v498_v17 = vsel %vm477_vm0, %v497_v18, %v461_v38  ;;  %vm531_vm0 = vcmask 0  }
  0xf6   :  { %v502_v8 = vsel %vm2070_vm7, %v498_v17, 0.0 }
  0xf7   :  { %v507_v12 = vsel %vm506_vm9, %v502_v8, 0.0 }
  0xf8   :  { %508 = vadd.xlane.f32.xlu0 %v507_v12 }
 0x101   :  { %s1045_s30 = spop %1044 }
 0x102   :  { %v510_v24 = vstv %s1045_s30 }
 0x105   :  { %s1047_s4 = spop %1046 }
 0x106   :  { %v1011_v36 = vstv %s1047_s4 }
 0x11c   :  { %v1007_v11 = vpop.xlane.xlu1 %1006 }
 0x11d   :  { %v1012_v10 = vmul.f32 %v1011_v36, %v1007_v11 }
 0x11f   :  { %v1016_v0 = vrot.slane %v1012_v10, 5 }
 0x15c   :  { %v505_v56 = vpop.xlane.xlu0 %504 }
 0x15d   :  { %v511_v54 = vmul.f32 %v510_v24, %v505_v56 }
 0x15f   :  { %v516_v60 = vrot.slane %v511_v54, 5 }
 0x173   :  { %v1010_v27 = vpop.xlane.xlu1 %1009 }
 0x174   :  { %v1013_v63 = vmul.f32 %v1011_v36, %v1010_v27 }
 0x176   :  { %v1017_v57 = vrot.slane %v1013_v63, 5 }
 0x178   :  { %v1018_v55 = vsel %vm515_vm1, %v1016_v0, %v1017_v57 }
 0x179   :  { %v1020_v14 = vsub.f32 %v1012_v10, %v1018_v55 }
 0x17b   :  { %v1022_v29 = vmax.f32 %v1020_v14, 0.0 }
 0x17d   :  { %v1023_v23 = vsel %vm523_vm13, %v1022_v29, 0.0 }
 0x17e   :  { %v1024_v20 = vrot.slane %v1023_v23, 4 }
 0x180   :  { %v1025_v30 = vadd.f32 %v1024_v20, %v1023_v23 }
 0x181   :  { %v509_v31 = vpop.xlane.xlu0 %508 }
 0x182   :  { %v1026_v7 = vrot.slane %v1025_v30, 2  ;;  %v512_v59 = vmul.f32 %v510_v24, %v509_v31 }
 0x184   :  { %v1027_v19 = vadd.f32 %v1026_v7, %v1025_v30  ;;  %v517_v62 = vrot.slane %v512_v59, 5 }
 0x186   :  { %v1028_v40 = vrot.slane %v1027_v19, 1  ;;  %v518_v39 = vsel %vm515_vm1, %v516_v60, %v517_v62 }
 0x187   :  { %v520_v16 = vsub.f32 %v511_v54, %v518_v39 }
 0x188   :  { %v1029_v43 = vadd.f32 %v1028_v40, %v1027_v19 }
 0x189   :  { %v522_v5 = vmax.f32 %v520_v16, 0.0 }
 0x18a   :  { %1030 = vst.msk [vmem:[%s2099_s3 + $0x1] sm:$0x1] %vm531_vm0, %v1029_v43 }
 0x18b   :  { %v524_v25 = vsel %vm523_vm13, %v522_v5, 0.0 }
 0x18c   :  { %v525_v46 = vrot.slane %v524_v25, 4 }
 0x18e   :  { %v526_v15 = vadd.f32 %v525_v46, %v524_v25 }
 0x190   :  { %v527_v26 = vrot.slane %v526_v15, 2 }
 0x192   :  { %v528_v47 = vadd.f32 %v527_v26, %v526_v15 }
 0x194   :  { %v529_v44 = vrot.slane %v528_v47, 1 }
 0x196   :  { %v530_v48 = vadd.f32 %v529_v44, %v528_v47 }
 0x198   :  { %532 = vst.msk [vmem:[%s2099_s3] sm:$0x1] %vm531_vm0, %v530_v48 }

</bundles_post_ra>
